<compile_context>
chip_gen: v7x
topology: tpu7x:2x2x1
jax: 0.10.0
libtpu: 0.0.40
codegen_flags: <defaults>
</compile_context>

<pallas_src>
import functools
import math

import jax
import jax.numpy as jnp
from jax import lax
from jax.experimental import pallas as pl
from jax.experimental.pallas import tpu as pltpu


def _round_up(x, m):
    return ((x + m - 1) // m) * m


def _physical_vmem_bytes():
    """Best-effort physical VMEM per TensorCore (64 MiB v7x, 128 MiB v5e/v6e)."""
    try:
        return int(pltpu.get_tpu_info().vmem_capacity_bytes)
    except Exception:
        pass
    try:
        kind = jax.devices()[0].device_kind.lower()
        if "v7" in kind:
            return 64 * 2 ** 20
    except Exception:
        pass
    return 128 * 2 ** 20


def _entropy_kernel(*refs, max_entropy, mxu_dtype, symmetric):
    if symmetric:
        p_ref, a_ref, e_ref, out_ref = refs
        pt_ref = None
    else:
        p_ref, pt_ref, a_ref, e_ref, out_ref = refs

    E = e_ref[...]                                     # [TC, N]  f32
    Emx = E.astype(mxu_dtype)                          # MXU operand dtype
    P = p_ref[...]                                     # [N, N]   ppi (mxu dtype)
    A = a_ref[...]                                     # ppi * log ppi (masked)

    dn = (((1,), (0,)), ((), ()))                      # contract LHS-last w/ RHS-first

    # S[c, j] = sum_i ppi[i, j] * E[c, i]   -- pm's per-column normalizer.
    S = lax.dot_general(Emx, P, dn, preferred_element_type=jnp.float32)
    if symmetric:
        # ppi == ppi^T  =>  E @ ppi^T == E @ ppi: reuse S (one matmul and one
        # resident N x N operand eliminated).
        PE = S
    else:
        PE = lax.dot_general(Emx, pt_ref[...], dn, preferred_element_type=jnp.float32)

    # EA[c, j] = sum_i E[c, i] * (ppi log ppi)[i, j]
    EA = lax.dot_general(Emx, A, dn, preferred_element_type=jnp.float32)
    # LP[c, j] = sum_i (E log E)[c, i] * ppi[i, j]
    e_pos = E > 0
    L = jnp.where(e_pos, E * jnp.log(jnp.where(e_pos, E, 1.0)), 0.0)
    LP = lax.dot_general(L.astype(mxu_dtype), P, dn, preferred_element_type=jnp.float32)

    # entropy[c, j] = -sum_i nan_to_num(pm * log pm) = log S - (EA + LP)/S  (S > 0)
    s_pos = S > 0
    inv_s = pl.reciprocal(S, approx=True)              # EUP slot; masked by s_pos
    ent = jnp.where(s_pos, jnp.log(jnp.where(s_pos, S, 1.0)) - (EA + LP) * inv_s, 0.0)

    # m_exp[c, j] = E * PE, normalized over nodes.  Exact reciprocal of the
    # [TC, 1] row sums (essentially free under MXU slack; avoids injecting
    # approx-reciprocal error into every score).  inf/nan preserved if a row
    # sum is zero, matching the reference's unscrubbed division.
    m = E * PE
    row_sum = jnp.sum(m, axis=1, keepdims=True)
    m = m * (1.0 / row_sum)

    score = jnp.sum(m * ent, axis=1)                   # [TC]
    tile_c = E.shape[0]
    out_ref[...] = jnp.reshape(score, (1, tile_c)) * (1.0 / max_entropy)  # lane-dense


def entropy_forward(exp, ppi, max_entropy, expand=False, *, symmetric=None,
                    tile_c=None, mxu_dtype=jnp.bfloat16, interpret=False):
    """Pallas implementation of EntropyModule.forward (exp is [C, N], ppi [N, N])."""
    exp = jnp.expand_dims(exp, 0) if expand else exp
    exp = jnp.asarray(exp, jnp.float32)
    ppi = jnp.asarray(ppi, jnp.float32)
    C, N = exp.shape
    assert ppi.shape == (N, N)

    if symmetric is None:
        try:                                   # auto-detect only on concrete inputs
            symmetric = bool(jnp.all(ppi == ppi.T))
        except Exception:
            symmetric = False

    phys_vmem = _physical_vmem_bytes()

    # ---- pad to TPU-friendly shapes. Zero-padded node columns/rows leave the
    #      math unchanged; padded sample rows (filled with 1s) are sliced off.
    n_pad = _round_up(max(N, 128), 128)
    if tile_c is None:
        tile_c = 512 if phys_vmem >= 96 * 2 ** 20 else 256   # bigger tiles on 128 MiB parts
    tile_c = max(128, (int(tile_c) // 128) * 128)
    c_pad = _round_up(max(C, 128), 128)
    tile_c = min(tile_c, c_pad)
    if c_pad // tile_c < 2 and c_pad > 128:
        # >= 2 grid steps so both v7x TensorCores get work under "parallel".
        tile_c = max(128, (c_pad // 2 // 128) * 128)
    c_pad = _round_up(c_pad, tile_c)

    ppi_p = jnp.zeros((n_pad, n_pad), jnp.float32).at[:N, :N].set(ppi)
    exp_p = jnp.zeros((c_pad, n_pad), jnp.float32).at[:C, :N].set(exp)
    exp_p = exp_p.at[C:, :N].set(1.0)                  # keep padded rows finite

    # One-time wrapper-side prep: ppi (and ppi^T only when needed) plus masked
    # ppi*log(ppi), cast to the MXU dtype.
    a_p = jnp.where(ppi_p > 0, ppi_p * jnp.log(jnp.where(ppi_p > 0, ppi_p, 1.0)), 0.0)
    p_mx = ppi_p.astype(mxu_dtype)
    a_mx = a_p.astype(mxu_dtype)
    if symmetric:
        operands = (p_mx, a_mx, exp_p)
    else:
        operands = (p_mx, ppi_p.T.astype(mxu_dtype), a_mx, exp_p)
    n_res = len(operands) - 1
    mxu_bytes = jnp.dtype(mxu_dtype).itemsize

    grid = (c_pad // tile_c,)
    n_mm = 3 if symmetric else 4
    cost = pl.CostEstimate(
        flops=int(n_mm * 2 * c_pad * n_pad * n_pad),
        transcendentals=int(3 * c_pad * n_pad + c_pad),
        bytes_accessed=int(n_res * n_pad * n_pad * mxu_bytes
                           + c_pad * n_pad * 4 + c_pad * 4),
    )
    kernel = functools.partial(_entropy_kernel, max_entropy=float(max_entropy),
                               mxu_dtype=mxu_dtype, symmetric=symmetric)
    exp_spec = pl.BlockSpec((tile_c, n_pad), lambda i: (i, 0))   # pipelined (2 bufs is enough)
    out_spec = pl.BlockSpec((1, tile_c), lambda i: (0, i))       # lane-dense scores

    def call(single_buffer_residents):
        if single_buffer_residents:
            # Whole-array VMEM operands: constant across the grid -> one copy,
            # no double buffering (halves resident ppi/A VMEM + HBM traffic).
            res_spec = pl.BlockSpec(memory_space=pltpu.MemorySpace.VMEM)
            res_bufs = 1
        else:
            res_spec = pl.BlockSpec((n_pad, n_pad), lambda i: (0, 0))
            res_bufs = 2
        vmem_est = (res_bufs * n_res * n_pad * n_pad * mxu_bytes  # resident ppi operands
                    + 2 * tile_c * n_pad * 4                      # double-buffered exp tile
                    + 2 * tile_c * 4                              # output tile
                    + 10 * tile_c * n_pad * 4)                    # f32 intermediates headroom
        vmem_cap = int(phys_vmem * 0.8)                           # headroom below physical VMEM
        vmem_limit = int(min(max(int(1.5 * vmem_est), 16 * 2 ** 20), vmem_cap))
        return pl.pallas_call(
            kernel,
            out_shape=jax.ShapeDtypeStruct((1, c_pad), jnp.float32),
            grid=grid,
            in_specs=[res_spec] * n_res + [exp_spec],
            out_specs=out_spec,
            compiler_params=pltpu.CompilerParams(
                dimension_semantics=("parallel",),
                vmem_limit_bytes=vmem_limit,
            ),
            cost_estimate=cost,
            interpret=interpret,
        )(*operands)

    try:
        out = call(True)
    except Exception:
        # Fallback: blocked constant-index specs (double-buffered residents),
        # the previously-validated configuration.
        out = call(False)

    return jnp.squeeze(out[0, :C])                     # [C] (scalar if C == 1)


def entropy_ref(exp, ppi, max_entropy, expand=False):
    """Pure-JAX transcription of the PyTorch forward (sanity check)."""
    exp = jnp.expand_dims(exp, 0) if expand else exp
    e = jnp.asarray(exp, jnp.float32).T                          # [N, C]
    ppi = jnp.asarray(ppi, jnp.float32)
    m = e * (ppi @ e)
    m = m / m.sum(0)
    pm = ppi[None, :, :] * (e.T[:, :, None] * e.T[:, None, :])   # [C, N, N]
    pm = jnp.nan_to_num(pm / pm.sum(1, keepdims=True))
    ent = -jnp.sum(jnp.nan_to_num(jnp.log(pm) * pm), axis=1)     # [C, N]
    score = jnp.sum(m * ent.T, axis=0)                           # [C]
    return jnp.squeeze(score / max_entropy)


if __name__ == "__main__":
    key = jax.random.PRNGKey(0)
    k1, k2, k3 = jax.random.split(key, 3)

    C, N = 4, 16                          # 4 samples/cells, 16 nodes in the PPI graph
    exp = jax.random.uniform(k1, (C, N), dtype=jnp.float32)      # expression (>= 0)
    ppi_sym = jax.random.uniform(k2, (N, N), dtype=jnp.float32)  # interaction weights
    ppi_sym = 0.5 * (ppi_sym + ppi_sym.T)                        # symmetric PPI
    max_entropy = math.log(N)

    # symmetric PPI -> auto-detected fast path (3 matmuls, 2 resident operands)
    out = jax.block_until_ready(entropy_forward(exp, ppi_sym, max_entropy, expand=False))
    ref = entropy_ref(exp, ppi_sym, max_entropy, expand=False)
    assert out.shape == ref.shape == (C,)
    assert jnp.allclose(out, ref, rtol=3e-2, atol=3e-3), (out, ref)

    # general (non-symmetric) PPI path (4 matmuls, resident ppi^T)
    ppi_ns = jax.random.uniform(k3, (N, N), dtype=jnp.float32)
    out_ns = jax.block_until_ready(entropy_forward(exp, ppi_ns, max_entropy, expand=False))
    ref_ns = entropy_ref(exp, ppi_ns, max_entropy, expand=False)
    assert out_ns.shape == ref_ns.shape == (C,)
    assert jnp.allclose(out_ns, ref_ns, rtol=3e-2, atol=3e-3), (out_ns, ref_ns)

    # expand path: single 1-D expression vector -> scalar score
    out1 = jax.block_until_ready(entropy_forward(exp[0], ppi_sym, max_entropy, expand=True))
    ref1 = entropy_ref(exp[0], ppi_sym, max_entropy, expand=True)
    assert out1.shape == ref1.shape == ()
    assert jnp.allclose(out1, ref1, rtol=3e-2, atol=3e-3), (out1, ref1)

    print("KERNEL_OK")
</pallas_src>

<mosaic_0001>
module attributes {stable_mosaic.version = 11 : i64} {
  func.func @_entropy_kernel(%arg0: i32, %arg1: memref<128x128xbf16, #tpu.memory_space<vmem>>, %arg2: memref<128x128xbf16, #tpu.memory_space<vmem>>, %arg3: memref<128x128xf32, #tpu.memory_space<vmem>>, %arg4: memref<1x128xf32, #tpu.memory_space<vmem>>) attributes {dimension_semantics = [#tpu.dimension_semantics<parallel>], iteration_bounds = array<i64: 1>, scalar_prefetch = 0 : i64, scratch_operands = 0 : i64, tpu.core_type = #tpu.core_type<tc>, window_params = [{pipeline_mode = #tpu.pipeline_mode<synchronous>, transform_indices = @transform_0, window_bounds = array<i64: 128, 128>}, {pipeline_mode = #tpu.pipeline_mode<synchronous>, transform_indices = @transform_1, window_bounds = array<i64: 128, 128>}, {transform_indices = @transform_2, window_bounds = array<i64: 128, 128>}, {transform_indices = @transform_3, window_bounds = array<i64: 1, 128>}]} {
    %c0 = arith.constant 0 : index
    %c0_0 = arith.constant 0 : index
    %0 = vector.load %arg3[%c0, %c0_0] : memref<128x128xf32, #tpu.memory_space<vmem>>, vector<128x128xf32>
    %1 = arith.truncf %0 : vector<128x128xf32> to vector<128x128xbf16>
    %c0_1 = arith.constant 0 : index
    %c0_2 = arith.constant 0 : index
    %2 = vector.load %arg1[%c0_1, %c0_2] : memref<128x128xbf16, #tpu.memory_space<vmem>>, vector<128x128xbf16>
    %c0_3 = arith.constant 0 : index
    %c0_4 = arith.constant 0 : index
    %3 = vector.load %arg2[%c0_3, %c0_4] : memref<128x128xbf16, #tpu.memory_space<vmem>>, vector<128x128xbf16>
    %cst = arith.constant dense<0.000000e+00> : vector<128x128xf32>
    %4 = tpu.matmul %1, %2, %cst {dimension_numbers = #tpu.dot_dimension_numbers<[1], [0], [0], [1], [0, 0, 1, 1], [], []>} : vector<128x128xbf16>, vector<128x128xbf16>, vector<128x128xf32> -> vector<128x128xf32>
    %cst_5 = arith.constant dense<0.000000e+00> : vector<128x128xf32>
    %5 = tpu.matmul %1, %3, %cst_5 {dimension_numbers = #tpu.dot_dimension_numbers<[1], [0], [0], [1], [0, 0, 1, 1], [], []>} : vector<128x128xbf16>, vector<128x128xbf16>, vector<128x128xf32> -> vector<128x128xf32>
    %cst_6 = arith.constant 0.000000e+00 : f32
    %6 = vector.broadcast %cst_6 : f32 to vector<128x128xf32>
    %7 = arith.cmpf ogt, %0, %6 : vector<128x128xf32>
    %cst_7 = arith.constant 1.000000e+00 : f32
    %8 = vector.broadcast %cst_7 : f32 to vector<128x128xf32>
    %9 = arith.select %7, %0, %8 : vector<128x128xi1>, vector<128x128xf32>
    %10 = math.log %9 : vector<128x128xf32>
    %11 = arith.mulf %0, %10 : vector<128x128xf32>
    %cst_8 = arith.constant 0.000000e+00 : f32
    %12 = vector.broadcast %cst_8 : f32 to vector<128x128xf32>
    %13 = arith.select %7, %11, %12 : vector<128x128xi1>, vector<128x128xf32>
    %14 = arith.truncf %13 : vector<128x128xf32> to vector<128x128xbf16>
    %cst_9 = arith.constant dense<0.000000e+00> : vector<128x128xf32>
    %15 = tpu.matmul %14, %2, %cst_9 {dimension_numbers = #tpu.dot_dimension_numbers<[1], [0], [0], [1], [0, 0, 1, 1], [], []>} : vector<128x128xbf16>, vector<128x128xbf16>, vector<128x128xf32> -> vector<128x128xf32>
    %cst_10 = arith.constant 0.000000e+00 : f32
    %16 = vector.broadcast %cst_10 : f32 to vector<128x128xf32>
    %17 = arith.cmpf ogt, %4, %16 : vector<128x128xf32>
    %18 = tpu.reciprocal %4 {approx = true} : vector<128x128xf32> -> vector<128x128xf32>
    %cst_11 = arith.constant 1.000000e+00 : f32
    %19 = vector.broadcast %cst_11 : f32 to vector<128x128xf32>
    %20 = arith.select %17, %4, %19 : vector<128x128xi1>, vector<128x128xf32>
    %21 = math.log %20 : vector<128x128xf32>
    %22 = arith.addf %5, %15 : vector<128x128xf32>
    %23 = arith.mulf %22, %18 : vector<128x128xf32>
    %24 = arith.subf %21, %23 : vector<128x128xf32>
    %cst_12 = arith.constant 0.000000e+00 : f32
    %25 = vector.broadcast %cst_12 : f32 to vector<128x128xf32>
    %26 = arith.select %17, %24, %25 : vector<128x128xi1>, vector<128x128xf32>
    %27 = arith.mulf %0, %4 : vector<128x128xf32>
    %cst_13 = arith.constant dense<0.000000e+00> : vector<128xf32>
    %28 = vector.multi_reduction <add>, %27, %cst_13 [1] : vector<128x128xf32> to vector<128xf32>
    %29 = vector.shape_cast %28 : vector<128xf32> to vector<128x1xf32>
    %cst_14 = arith.constant 1.000000e+00 : f32
    %30 = vector.broadcast %cst_14 : f32 to vector<128x1xf32>
    %31 = arith.divf %30, %29 : vector<128x1xf32>
    %32 = vector.broadcast %31 : vector<128x1xf32> to vector<128x128xf32>
    %33 = arith.mulf %27, %32 : vector<128x128xf32>
    %34 = arith.mulf %33, %26 : vector<128x128xf32>
    %cst_15 = arith.constant dense<0.000000e+00> : vector<128xf32>
    %35 = vector.multi_reduction <add>, %34, %cst_15 [1] : vector<128x128xf32> to vector<128xf32>
    %36 = vector.shape_cast %35 : vector<128xf32> to vector<1x128xf32>
    %cst_16 = arith.constant 0.360673755 : f32
    %37 = vector.broadcast %cst_16 : f32 to vector<1x128xf32>
    %38 = arith.mulf %36, %37 : vector<1x128xf32>
    %c0_17 = arith.constant 0 : index
    %c0_18 = arith.constant 0 : index
    %39 = vector.load %arg4[%c0_17, %c0_18] : memref<1x128xf32, #tpu.memory_space<vmem>>, vector<1x128xf32>
    tpu.vector_store %arg4[%c0_17, %c0_18], %38 {strides = array<i32>} : memref<1x128xf32, #tpu.memory_space<vmem>>, vector<1x128xf32>,
    return
  }
  func.func @transform_0(%arg0: i32) -> (i32, i32) {
    %c0_i32 = arith.constant 0 : i32
    %c0_i32_0 = arith.constant 0 : i32
    %c0_i32_1 = arith.constant 0 : i32
    return %c0_i32, %c0_i32_0 : i32, i32
  }
  func.func @transform_1(%arg0: i32) -> (i32, i32) {
    %c0_i32 = arith.constant 0 : i32
    %c0_i32_0 = arith.constant 0 : i32
    %c0_i32_1 = arith.constant 0 : i32
    return %c0_i32, %c0_i32_0 : i32, i32
  }
  func.func @transform_2(%arg0: i32) -> (i32, i32) {
    %c0_i32 = arith.constant 0 : i32
    %c0_i32_0 = arith.constant 0 : i32
    return %arg0, %c0_i32 : i32, i32
  }
  func.func @transform_3(%arg0: i32) -> (i32, i32) {
    %c0_i32 = arith.constant 0 : i32
    %c0_i32_0 = arith.constant 0 : i32
    return %c0_i32, %arg0 : i32, i32
  }
}

module attributes {stable_mosaic.version = 11 : i64} {
  func.func @_entropy_kernel(%arg0: i32, %arg1: memref<128x128xbf16, #tpu.memory_space<vmem>>, %arg2: memref<128x128xbf16, #tpu.memory_space<vmem>>, %arg3: memref<128x128xf32, #tpu.memory_space<vmem>>, %arg4: memref<1x128xf32, #tpu.memory_space<vmem>>) attributes {dimension_semantics = [#tpu.dimension_semantics<parallel>], iteration_bounds = array<i64: 1>, scalar_prefetch = 0 : i64, scratch_operands = 0 : i64, tpu.core_type = #tpu.core_type<tc>, window_params = [{pipeline_mode = #tpu.pipeline_mode<synchronous>, transform_indices = @transform_0, window_bounds = array<i64: 128, 128>}, {pipeline_mode = #tpu.pipeline_mode<synchronous>, transform_indices = @transform_1, window_bounds = array<i64: 128, 128>}, {transform_indices = @transform_2, window_bounds = array<i64: 128, 128>}, {transform_indices = @transform_3, window_bounds = array<i64: 1, 128>}]} {
    %c0 = arith.constant 0 : index
    %c0_0 = arith.constant 0 : index
    %0 = vector.load %arg3[%c0, %c0_0] : memref<128x128xf32, #tpu.memory_space<vmem>>, vector<128x128xf32>
    %1 = arith.truncf %0 : vector<128x128xf32> to vector<128x128xbf16>
    %c0_1 = arith.constant 0 : index
    %c0_2 = arith.constant 0 : index
    %2 = vector.load %arg1[%c0_1, %c0_2] : memref<128x128xbf16, #tpu.memory_space<vmem>>, vector<128x128xbf16>
    %c0_3 = arith.constant 0 : index
    %c0_4 = arith.constant 0 : index
    %3 = vector.load %arg2[%c0_3, %c0_4] : memref<128x128xbf16, #tpu.memory_space<vmem>>, vector<128x128xbf16>
    %cst = arith.constant dense<0.000000e+00> : vector<128x128xf32>
    %4 = tpu.matmul %1, %2, %cst {dimension_numbers = #tpu.dot_dimension_numbers<[1], [0], [0], [1], [0, 0, 1, 1], [], []>} : vector<128x128xbf16>, vector<128x128xbf16>, vector<128x128xf32> -> vector<128x128xf32>
    %cst_5 = arith.constant dense<0.000000e+00> : vector<128x128xf32>
    %5 = tpu.matmul %1, %3, %cst_5 {dimension_numbers = #tpu.dot_dimension_numbers<[1], [0], [0], [1], [0, 0, 1, 1], [], []>} : vector<128x128xbf16>, vector<128x128xbf16>, vector<128x128xf32> -> vector<128x128xf32>
    %cst_6 = arith.constant 0.000000e+00 : f32
    %6 = vector.broadcast %cst_6 : f32 to vector<128x128xf32>
    %7 = arith.cmpf ogt, %0, %6 : vector<128x128xf32>
    %cst_7 = arith.constant 1.000000e+00 : f32
    %8 = vector.broadcast %cst_7 : f32 to vector<128x128xf32>
    %9 = arith.select %7, %0, %8 : vector<128x128xi1>, vector<128x128xf32>
    %10 = math.log %9 : vector<128x128xf32>
    %11 = arith.mulf %0, %10 : vector<128x128xf32>
    %cst_8 = arith.constant 0.000000e+00 : f32
    %12 = vector.broadcast %cst_8 : f32 to vector<128x128xf32>
    %13 = arith.select %7, %11, %12 : vector<128x128xi1>, vector<128x128xf32>
    %14 = arith.truncf %13 : vector<128x128xf32> to vector<128x128xbf16>
    %cst_9 = arith.constant dense<0.000000e+00> : vector<128x128xf32>
    %15 = tpu.matmul %14, %2, %cst_9 {dimension_numbers = #tpu.dot_dimension_numbers<[1], [0], [0], [1], [0, 0, 1, 1], [], []>} : vector<128x128xbf16>, vector<128x128xbf16>, vector<128x128xf32> -> vector<128x128xf32>
    %cst_10 = arith.constant 0.000000e+00 : f32
    %16 = vector.broadcast %cst_10 : f32 to vector<128x128xf32>
    %17 = arith.cmpf ogt, %4, %16 : vector<128x128xf32>
    %18 = tpu.reciprocal %4 {approx = true} : vector<128x128xf32> -> vector<128x128xf32>
    %cst_11 = arith.constant 1.000000e+00 : f32
    %19 = vector.broadcast %cst_11 : f32 to vector<128x128xf32>
    %20 = arith.select %17, %4, %19 : vector<128x128xi1>, vector<128x128xf32>
    %21 = math.log %20 : vector<128x128xf32>
    %22 = arith.addf %5, %15 : vector<128x128xf32>
    %23 = arith.mulf %22, %18 : vector<128x128xf32>
    %24 = arith.subf %21, %23 : vector<128x128xf32>
    %cst_12 = arith.constant 0.000000e+00 : f32
    %25 = vector.broadcast %cst_12 : f32 to vector<128x128xf32>
    %26 = arith.select %17, %24, %25 : vector<128x128xi1>, vector<128x128xf32>
    %27 = arith.mulf %0, %4 : vector<128x128xf32>
    %cst_13 = arith.constant dense<0.000000e+00> : vector<128xf32>
    %28 = vector.multi_reduction <add>, %27, %cst_13 [1] : vector<128x128xf32> to vector<128xf32>
    %29 = vector.shape_cast %28 : vector<128xf32> to vector<128x1xf32>
    %cst_14 = arith.constant 1.000000e+00 : f32
    %30 = vector.broadcast %cst_14 : f32 to vector<128x1xf32>
    %31 = arith.divf %30, %29 : vector<128x1xf32>
    %32 = vector.broadcast %31 : vector<128x1xf32> to vector<128x128xf32>
    %33 = arith.mulf %27, %32 : vector<128x128xf32>
    %34 = arith.mulf %33, %26 : vector<128x128xf32>
    %cst_15 = arith.constant dense<0.000000e+00> : vector<128xf32>
    %35 = vector.multi_reduction <add>, %34, %cst_15 [1] : vector<128x128xf32> to vector<128xf32>
    %36 = vector.shape_cast %35 : vector<128xf32> to vector<1x128xf32>
    %cst_16 = arith.constant 0.360673755 : f32
    %37 = vector.broadcast %cst_16 : f32 to vector<1x128xf32>
    %38 = arith.mulf %36, %37 : vector<1x128xf32>
    %c0_17 = arith.constant 0 : index
    %c0_18 = arith.constant 0 : index
    %39 = vector.load %arg4[%c0_17, %c0_18] : memref<1x128xf32, #tpu.memory_space<vmem>>, vector<1x128xf32>
    tpu.vector_store %arg4[%c0_17, %c0_18], %38 {strides = array<i32>} : memref<1x128xf32, #tpu.memory_space<vmem>>, vector<1x128xf32>,
    return
  }
  func.func @transform_0(%arg0: i32) -> (i32, i32) {
    %c0_i32 = arith.constant 0 : i32
    %c0_i32_0 = arith.constant 0 : i32
    %c0_i32_1 = arith.constant 0 : i32
    return %c0_i32, %c0_i32_0 : i32, i32
  }
  func.func @transform_1(%arg0: i32) -> (i32, i32) {
    %c0_i32 = arith.constant 0 : i32
    %c0_i32_0 = arith.constant 0 : i32
    %c0_i32_1 = arith.constant 0 : i32
    return %c0_i32, %c0_i32_0 : i32, i32
  }
  func.func @transform_2(%arg0: i32) -> (i32, i32) {
    %c0_i32 = arith.constant 0 : i32
    %c0_i32_0 = arith.constant 0 : i32
    return %arg0, %c0_i32 : i32, i32
  }
  func.func @transform_3(%arg0: i32) -> (i32, i32) {
    %c0_i32 = arith.constant 0 : i32
    %c0_i32_0 = arith.constant 0 : i32
    return %c0_i32, %arg0 : i32, i32
  }
}

</mosaic_0001>

<bundles_post_ra>
// kernel: tpu_custom_call.1
= control target key start
LH: loop header
LB: loop body
LE: loop exit
PB: predicated region body
PF: predicated region fallthrough
CT: control target
= control target key end

     0   :  { %8 = vsyncpa [#allocation3], 0  ;;  %s2154_s0 = inlined_call_operand.hbm [shape: bf16[128,128], index: 0, kind: input, shape index: {}]   ;;  %s2155_s1 = inlined_call_operand.hbm [shape: bf16[128,128], index: 1, kind: input, shape index: {}]   ;;  %s2156_s2 = inlined_call_operand.hbm [shape: f32[128,128], index: 2, kind: input, shape index: {}]   ;;  %s2157_s3 = inlined_call_operand.hbm [shape: f32[1,128], index: 3, kind: output, shape index: {}]  }
   0x1   :  { %9 = vsyncpa [#allocation6], 0 }
   0x2   :  { %10 = vsyncpa [#allocation4], 0  ;;  %s1499_s12 = smov [#allocation5]   ;;  %s1500_s14 = smov [#allocation2]  }
   0x3   :  { %s28_s13 = sshll.u32 %s1499_s12, 4  ;;  %s16_s15 = sshll.u32 %s1500_s14, 4  ;;  %s29_s13 = int_to_ptr.vmem [resolvable:$true] %s28_s13  ;;  %s1527_s15 = int_to_ptr.vmem [resolvable:$true] %s16_s15 }
   0x4   :  { %s1405_s18 = scalar_lea.hbm %s2155_s1, 1024 }
   0x5   :  { %p1406_p0 = scmp.ne.s32.totalorder %s2155_s1, %s1405_s18  ;;  %p1409_p1 = scmp.lt.u32.totalorder %s1405_s18, %s2155_s1 }
   0x7   :  { %p1411_p2 = pnand %p1409_p1, %p1406_p0 }
   0x9   :  { %1414 = shalt.err (!%p1411_p2)
}
   0xa   :  { %s1415_s23 = scalar_lea.vmem %s29_s13, 1024  ;;  %p1420_p4 = scmp.lt.s32.totalorder %s29_s13, %s29_s13 }
   0xb   :  { %p1416_p3 = scmp.ne.s32.totalorder %s29_s13, %s1415_s23  ;;  %p1421_p5 = scmp.lt.s32.totalorder %s1415_s23, %s1415_s23 }
   0xd   :  { %p1422_p6 = por %p1421_p5, %p1420_p4 }
   0xf   :  { %p1423_p7 = pnand %p1422_p6, %p1416_p3 }
  0x11   :  { %1426 = shalt.err (!%p1423_p7)
}
  0x12   :  { %s1501_s24 = smov 64   ;;  %s1502_s25 = smov 4  }
  0x13   :  { %34 = dma.hbm_to_vmem [thread:$0]  %s2155_s1, 1024, %s29_s13, [#allocation6], %s1501_s24, %s1501_s24, %s1502_s25  }
  0x14   :  { %s1427_s30 = scalar_lea.hbm %s2154_s0, 1024 }
  0x15   :  { %p1428_p8 = scmp.ne.s32.totalorder %s2154_s0, %s1427_s30  ;;  %p1431_p9 = scmp.lt.u32.totalorder %s1427_s30, %s2154_s0 }
  0x17   :  { %p1433_p10 = pnand %p1431_p9, %p1428_p8 }
  0x19   :  { %1436 = shalt.err (!%p1433_p10)
}
  0x1a   :  { %s1437_s8 = scalar_lea.vmem %s1527_s15, 1024  ;;  %p1442_p12 = scmp.lt.s32.totalorder %s1527_s15, %s1527_s15 }
  0x1b   :  { %p1438_p11 = scmp.ne.s32.totalorder %s1527_s15, %s1437_s8  ;;  %p1443_p13 = scmp.lt.s32.totalorder %s1437_s8, %s1437_s8 }
  0x1d   :  { %p1444_p0 = por %p1443_p13, %p1442_p12 }
  0x1f   :  { %p1445_p1 = pnand %p1444_p0, %p1438_p11 }
  0x21   :  { %1448 = shalt.err (!%p1445_p1)
}
  0x22   :  { %22 = dma.hbm_to_vmem [thread:$0]  %s2154_s0, 1024, %s1527_s15, [#allocation3], %s1501_s24, %s1501_s24, %s1502_s25  }
  0x23   :  { %s1503_s10 = smov [#allocation7]   ;;  %s1449_s14 = scalar_lea.hbm %s2156_s2, 2048 }
  0x24   :  { %s40_s11 = sshll.u32 %s1503_s10, 4  ;;  %p1450_p2 = scmp.ne.s32.totalorder %s2156_s2, %s1449_s14  ;;  %s41_s11 = int_to_ptr.vmem [resolvable:$true] %s40_s11 }
  0x25   :  { %p1453_p3 = scmp.lt.u32.totalorder %s1449_s14, %s2156_s2 }
  0x27   :  { %p1455_p4 = pnand %p1453_p3, %p1450_p2 }
  0x29   :  { %1458 = shalt.err (!%p1455_p4)
}
  0x2a   :  { %s1459_s20 = scalar_lea.vmem %s41_s11, 2048  ;;  %p1464_p6 = scmp.lt.s32.totalorder %s41_s11, %s41_s11 }
  0x2b   :  { %p1460_p5 = scmp.ne.s32.totalorder %s41_s11, %s1459_s20  ;;  %p1465_p7 = scmp.lt.s32.totalorder %s1459_s20, %s1459_s20 }
  0x2d   :  { %p1466_p8 = por %p1465_p7, %p1464_p6 }
  0x2f   :  { %p1467_p9 = pnand %p1466_p8, %p1460_p5 }
  0x31   :  { %1470 = shalt.err (!%p1467_p9)
}
  0x32   :  { %s1504_s0 = smov 128   ;;  %s1505_s15 = smov 8  }
  0x33   :  { %46 = dma.hbm_to_vmem [thread:$0]  %s2156_s2, 2048, %s41_s11, [#allocation6], %s1504_s0, %s1504_s0, %s1505_s15  }
  0x34   :  { %1493 = dma.done.wait [#allocation3], 1024  }
  0x35   :  { %1494 = vsyncadd [#allocation3], 4294966272 }
  0x36   :  { %1495 = dma.done.wait [#allocation6], 3072  }
  0x37   :  { %1496 = vsyncadd [#allocation6], 4294964224  ;;  %v1261_v0 = vld [vmem:[#allocation2] sm:$0xff]   ;;  %v1262_v1 = vld [vmem:[#allocation2 + $0x8] sm:$0xff]   ;;  %s1506_s2 = smov [#allocation8]  }
  0x38   :  { %1125 = vmatprep.subr.bf16.mxu0 %v1261_v0  ;;  %1157 = vmatprep.subr.bf16.mxu1 %v1261_v0  ;;  %v1263_v2 = vld [vmem:[#allocation2 + $0x10] sm:$0xff]   ;;  %v1264_v3 = vld [vmem:[#allocation2 + $0x18] sm:$0xff]   ;;  %v1570_v4 = vld [vmem:[#allocation7] sm:$0xff]  ;;  %s1027_s23 = sshll.u32 %s1506_s2, 4  ;;  %s1028_s23 = int_to_ptr.vmem [resolvable:$true] %s1027_s23 }
  0x39   :  { %1126 = vmatpush3.bf16.msra.mxu0 %v1261_v0  ;;  %1158 = vmatpush3.bf16.msra.mxu1 %v1261_v0  ;;  %v1572_v5 = vld [vmem:[#allocation7 + $0x8] sm:$0xff]  ;;  %v1574_v6 = vld [vmem:[#allocation7 + $0x10] sm:$0xff]  ;;  %vm258_vm0 = vcmp.gt.f32.partialorder %v1570_v4, 0.0  ;;  %v1582_v8 = vld [vmem:[#allocation7 + $0x18] sm:$0xff]  ;;  %s1471_s24 = scalar_lea.vmem %s1028_s23, 16  ;;  %s1475_s25 = scalar_lea.vmem %s1028_s23, 32 }
  0x3a   :  { %1127 = vmatprep.subr.bf16.mxu0 %v1262_v1  ;;  %1159 = vmatprep.subr.bf16.mxu1 %v1262_v1  ;;  %v1578_v7 = vpack.c.bf16 %v1572_v5, %v1570_v4  ;;  %vm259_vm1 = vcmp.gt.f32.partialorder %v1572_v5, 0.0  ;;  %vm260_vm2 = vcmp.gt.f32.partialorder %v1574_v6, 0.0  ;;  %v274_v9 = vsel %vm258_vm0, %v1570_v4, 1.0  ;;  %v1265_v13 = vld [vmem:[#allocation2 + $0x20] sm:$0xff]   ;;  %v1600_v15 = vld [vmem:[#allocation7 + $0x28] sm:$0xff]  ;;  %v1605_v16 = vld [vmem:[#allocation7 + $0x30] sm:$0xff]  ;;  %p1472_p10 = scmp.ne.s32.totalorder %s1028_s23, %s1471_s24  ;;  %p1476_p11 = scmp.lt.s32.totalorder %s1028_s23, %s1028_s23 }
  0x3b   :  { %v275_v10 = vsel %vm259_vm1, %v1572_v5, 1.0  ;;  %vm261_vm3 = vcmp.gt.f32.partialorder %v1582_v8, 0.0  ;;  %1277 = vlog2.f32 %v274_v9  ;;  %v276_v11 = vsel %vm260_vm2, %v1574_v6, 1.0  ;;  %v1598_v14 = vld [vmem:[#allocation7 + $0x20] sm:$0xff]  ;;  %v1607_v17 = vld [vmem:[#allocation7 + $0x38] sm:$0xff]  ;;  %v1266_v20 = vld [vmem:[#allocation2 + $0x28] sm:$0xff]   ;;  %p1477_p12 = scmp.lt.s32.totalorder %s1475_s25, %s1471_s24 }
  0x3c   :  { %v277_v12 = vsel %vm261_vm3, %v1582_v8, 1.0  ;;  %1279 = vlog2.f32 %v275_v10  ;;  %1141 = vmatprep.mubr.bf16.mxu0 %v1578_v7  ;;  %vm262_vm4 = vcmp.gt.f32.partialorder %v1598_v14, 0.0  ;;  %vm263_vm5 = vcmp.gt.f32.partialorder %v1600_v15, 0.0  ;;  %v1623_v23 = vld [vmem:[#allocation7 + $0x40] sm:$0xff]  ;;  %v1625_v24 = vld [vmem:[#allocation7 + $0x48] sm:$0xff]  ;;  %v1628_v25 = vld [vmem:[#allocation7 + $0x50] sm:$0xff] }
  0x3d   :  { %1128 = vmatpush3.bf16.msra.mxu0 %v1262_v1  ;;  %1160 = vmatpush3.bf16.msra.mxu1 %v1262_v1  ;;  %1281 = vlog2.f32 %v276_v11  ;;  %v278_v18 = vsel %vm262_vm4, %v1598_v14, 1.0  ;;  %v279_v19 = vsel %vm263_vm5, %v1600_v15, 1.0  ;;  %vm264_vm6 = vcmp.gt.f32.partialorder %v1605_v16, 0.0  ;;  %v1630_v26 = vld [vmem:[#allocation7 + $0x58] sm:$0xff]  ;;  %v1267_v29 = vld [vmem:[#allocation2 + $0x30] sm:$0xff]   ;;  %v1641_v30 = vld [vmem:[#allocation7 + $0x60] sm:$0xff]  ;;  %p1478_p13 = por %p1477_p12, %p1476_p11 }
  0x3e   :  { %1129 = vmatprep.subr.bf16.mxu0 %v1263_v2  ;;  %1161 = vmatprep.subr.bf16.mxu1 %v1263_v2  ;;  %1283 = vlog2.f32 %v277_v12  ;;  %vm265_vm7 = vcmp.gt.f32.partialorder %v1607_v17, 0.0  ;;  %v280_v21 = vsel %vm264_vm6, %v1605_v16, 1.0  ;;  %vm266_vm8 = vcmp.gt.f32.partialorder %v1623_v23, 0.0  ;;  %v1646_v33 = vld [vmem:[#allocation7 + $0x68] sm:$0xff]  ;;  %v1656_v40 = vld [vmem:[#allocation7 + $0x70] sm:$0xff]  ;;  %v1268_v42 = vld [vmem:[#allocation2 + $0x38] sm:$0xff]  }
  0x3f   :  { %1285 = vlog2.f32 %v278_v18  ;;  %v281_v22 = vsel %vm265_vm7, %v1607_v17, 1.0  ;;  %vm267_vm9 = vcmp.gt.f32.partialorder %v1625_v24, 0.0  ;;  %v282_v27 = vsel %vm266_vm8, %v1623_v23, 1.0  ;;  %v1659_v45 = vld [vmem:[#allocation7 + $0x78] sm:$0xff]  ;;  %vm1669_vm14 = vmpackc.low %vm259_vm1, %vm258_vm0  ;;  %v1269_v59 = vld [vmem:[#allocation5] sm:$0xff]   ;;  %p1479_p0 = pnand %p1478_p13, %p1472_p10 }
  0x40   :  { %1287 = vlog2.f32 %v279_v19  ;;  %v283_v28 = vsel %vm267_vm9, %v1625_v24, 1.0  ;;  %vm268_vm10 = vcmp.gt.f32.partialorder %v1628_v25, 0.0  ;;  %vm269_vm11 = vcmp.gt.f32.partialorder %v1630_v26, 0.0  ;;  %vm1048_vm0 = vmpackc.low %vm261_vm3, %vm260_vm2  ;;  %v1270_v11 = vld [vmem:[#allocation5 + $0x8] sm:$0xff]  }
  0x41   :  { %1130 = vmatpush3.bf16.msra.mxu0 %v1263_v2  ;;  %1162 = vmatpush3.bf16.msra.mxu1 %v1263_v2  ;;  %1289 = vlog2.f32 %v280_v21  ;;  %v284_v32 = vsel %vm268_vm10, %v1628_v25, 1.0  ;;  %vm270_vm12 = vcmp.gt.f32.partialorder %v1641_v30, 0.0  ;;  %v285_v36 = vsel %vm269_vm11, %v1630_v26, 1.0  ;;  %vm1051_vm1 = vmpackc.low %vm263_vm5, %vm262_vm4 }
  0x42   :  { %1131 = vmatprep.subr.bf16.mxu0 %v1264_v3  ;;  %1163 = vmatprep.subr.bf16.mxu1 %v1264_v3  ;;  %1291 = vlog2.f32 %v281_v22  ;;  %vm2158_vm13 = vcmp.gt.f32.partialorder %v1646_v33, 0.0  ;;  %v286_v39 = vsel %vm270_vm12, %v1641_v30, 1.0  ;;  %vm272_vm15 = vcmp.gt.f32.partialorder %v1656_v40, 0.0  ;;  %vm1054_vm2 = vmpackc.low %vm265_vm7, %vm264_vm6 }
  0x43   :  { %1293 = vlog2.f32 %v282_v27  ;;  %v287_v49 = vsel %vm2158_vm13, %v1646_v33, 1.0  ;;  %vm273_vm13 = vcmp.gt.f32.partialorder %v1659_v45, 0.0  ;;  %v1681_v61 = vpack.c.bf16 %v1582_v8, %v1574_v6  ;;  %vm1057_vm3 = vmpackc.low %vm267_vm9, %vm266_vm8 }
  0x44   :  { %1295 = vlog2.f32 %v283_v28  ;;  %v288_v0 = vsel %vm272_vm15, %v1656_v40, 1.0  ;;  %v289_v10 = vsel %vm273_vm13, %v1659_v45, 1.0  ;;  %v1697_v12 = vpack.c.bf16 %v1600_v15, %v1598_v14  ;;  %vm1060_vm4 = vmpackc.low %vm269_vm11, %vm268_vm10 }
  0x45   :  { %1132 = vmatpush3.bf16.msra.mxu0 %v1264_v3  ;;  %1164 = vmatpush3.bf16.msra.mxu1 %v1264_v3  ;;  %v1278_v31 = vpop.eup %1277  ;;  %1297 = vlog2.f32 %v284_v32  ;;  %vm2178_vm5 = vcmp.gt.f32.partialorder %v1646_v33, 0.0  ;;  %vm1066_vm7 = vmpackc.low %vm273_vm13, %vm272_vm15 }
  0x46   :  { %1133 = vmatprep.subr.bf16.mxu0 %v1265_v13  ;;  %1165 = vmatprep.subr.bf16.mxu1 %v1265_v13  ;;  %v1280_v34 = vpop.eup %1279  ;;  %v291_v35 = vmul.f32 0.6931472, %v1278_v31  ;;  %1299 = vlog2.f32 %v285_v36  ;;  %vm1063_vm6 = vmpackc.low %vm2178_vm5, %vm270_vm12 }
  0x47   :  { %v1282_v37 = vpop.eup %1281  ;;  %v293_v38 = vmul.f32 0.6931472, %v1280_v34  ;;  %1301 = vlog2.f32 %v286_v39  ;;  %v1272_v39 = vld [vmem:[#allocation5 + $0x18] sm:$0xff]  }
  0x48   :  { %v1284_v41 = vpop.eup %1283  ;;  %v322_v43 = vmul.f32 %v291_v35, %v1570_v4  ;;  %v295_v44 = vmul.f32 0.6931472, %v1282_v37  ;;  %1303 = vlog2.f32 %v287_v49  ;;  %v1711_v35 = vpack.c.bf16 %v1607_v17, %v1605_v16 }
  0x49   :  { %1134 = vmatpush3.bf16.msra.mxu0 %v1265_v13  ;;  %1166 = vmatpush3.bf16.msra.mxu1 %v1265_v13  ;;  %v1286_v46 = vpop.eup %1285  ;;  %v323_v47 = vmul.f32 %v293_v38, %v1572_v5  ;;  %v297_v48 = vmul.f32 0.6931472, %v1284_v41  ;;  %1305 = vlog2.f32 %v288_v0  ;;  %v77_v41 = vpack.c.bf16 %v1625_v24, %v1623_v23 }
  0x4a   :  { %1135 = vmatprep.subr.bf16.mxu0 %v1266_v20  ;;  %1167 = vmatprep.subr.bf16.mxu1 %v1266_v20  ;;  %v1288_v50 = vpop.eup %1287  ;;  %v324_v52 = vmul.f32 %v295_v44, %v1574_v6  ;;  %v299_v53 = vmul.f32 0.6931472, %v1286_v46  ;;  %1307 = vlog2.f32 %v289_v10  ;;  %v80_v0 = vpack.c.bf16 %v1659_v45, %v1656_v40 }
  0x4b   :  { %v1290_v54 = vpop.eup %1289  ;;  %v1046_v55 = vpack.c.bf16 %v323_v47, %v322_v43  ;;  %v325_v56 = vmul.f32 %v297_v48, %v1582_v8  ;;  %v301_v57 = vmul.f32 0.6931472, %v1288_v50  ;;  %v1273_v50 = vld [vmem:[#allocation5 + $0x20] sm:$0xff]  }
  0x4c   :  { %v1292_v58 = vpop.eup %1291  ;;  %v326_v62 = vmul.f32 %v299_v53, %v1598_v14  ;;  %v303_v3 = vmul.f32 0.6931472, %v1290_v54  ;;  %v78_v53 = vpack.c.bf16 %v1630_v26, %v1628_v25 }
  0x4d   :  { %1136 = vmatpush3.bf16.msra.mxu0 %v1266_v20  ;;  %1168 = vmatpush3.bf16.msra.mxu1 %v1266_v20  ;;  %v1294_v60 = vpop.eup %1293  ;;  %v327_v63 = vmul.f32 %v301_v57, %v1600_v15  ;;  %v1049_v2 = vpack.c.bf16 %v325_v56, %v324_v52  ;;  %v305_v9 = vmul.f32 0.6931472, %v1292_v58  ;;  %v1274_v57 = vld [vmem:[#allocation5 + $0x28] sm:$0xff]   ;;  %v79_v58 = vpack.c.bf16 %v1646_v33, %v1641_v30 }
  0x4e   :  { %1137 = vmatprep.subr.bf16.mxu0 %v1267_v29  ;;  %1169 = vmatprep.subr.bf16.mxu1 %v1267_v29  ;;  %v1296_v1 = vpop.eup %1295  ;;  %v307_v18 = vmul.f32 0.6931472, %v1294_v60  ;;  %v328_v21 = vmul.f32 %v303_v3, %v1605_v16 }
  0x4f   :  { %1173 = vmatprep.mubr.msk.bf16.mxu1 %vm1669_vm14, %v1046_v55  ;;  %v1052_v13 = vpack.c.bf16 %v327_v63, %v326_v62  ;;  %v309_v19 = vmul.f32 0.6931472, %v1296_v1  ;;  %v1298_v20 = vpop.eup %1297  ;;  %v329_v22 = vmul.f32 %v305_v9, %v1607_v17  ;;  %v1275_v63 = vld [vmem:[#allocation5 + $0x30] sm:$0xff]  }
  0x50   :  { %v1300_v27 = vpop.eup %1299  ;;  %v330_v31 = vmul.f32 %v307_v18, %v1623_v23  ;;  %v311_v37 = vmul.f32 0.6931472, %v1298_v20 }
  0x51   :  { %1138 = vmatpush3.bf16.msra.mxu0 %v1267_v29  ;;  %1170 = vmatpush3.bf16.msra.mxu1 %v1267_v29  ;;  %v1302_v28 = vpop.eup %1301  ;;  %v1271_v29 = vld [vmem:[#allocation5 + $0x10] sm:$0xff]   ;;  %v331_v32 = vmul.f32 %v309_v19, %v1625_v24  ;;  %v1055_v36 = vpack.c.bf16 %v329_v22, %v328_v21  ;;  %v313_v38 = vmul.f32 0.6931472, %v1300_v27 }
  0x52   :  { %1139 = vmatprep.subr.bf16.mxu0 %v1268_v42  ;;  %1171 = vmatprep.subr.bf16.mxu1 %v1268_v42  ;;  %v1304_v34 = vpop.eup %1303  ;;  %v315_v43 = vmul.f32 0.6931472, %v1302_v28  ;;  %v332_v47 = vmul.f32 %v311_v37, %v1628_v25 }
  0x53   :  { %v317_v44 = vmul.f32 0.6931472, %v1304_v34  ;;  %v1306_v46 = vpop.eup %1305  ;;  %v333_v48 = vmul.f32 %v313_v38, %v1630_v26 }
  0x54   :  { %v1308_v49 = vpop.eup %1307  ;;  %v334_v51 = vmul.f32 %v315_v43, %v1641_v30  ;;  %v319_v55 = vmul.f32 0.6931472, %v1306_v46 }
  0x55   :  { %1140 = vmatpush3.bf16.msra.mxu0 %v1268_v42  ;;  %1172 = vmatpush3.bf16.msra.mxu1 %v1268_v42  ;;  %v1058_v42 = vpack.c.bf16 %v331_v32, %v330_v31  ;;  %v335_v52 = vmul.f32 %v317_v44, %v1646_v33  ;;  %v1061_v54 = vpack.c.bf16 %v333_v48, %v332_v47  ;;  %v321_v56 = vmul.f32 0.6931472, %v1308_v49 }
  0x56   :  { %1189 = vmatprep.subr.bf16.mxu0 %v1269_v59  ;;  %1221 = vmatprep.subr.bf16.mxu1 %v1269_v59  ;;  %v336_v60 = vmul.f32 %v319_v55, %v1656_v40 }
  0x57   :  { %v337_v62 = vmul.f32 %v321_v56, %v1659_v45 }
  0x58   :  { %1142 = vmatmul.mubr.bf16.vlgmr.msra.gmra.mrb[0].mxu0 %v1681_v61  ;;  %1174 = vmatmul.mubr.msk.bf16.vlgmr.msra.gmra.mrb[0].mxu1 %vm1048_vm0, %v1049_v2  ;;  %v1276_v2 = vld [vmem:[#allocation5 + $0x38] sm:$0xff]  }
  0x59   :  { %1190 = vmatpush3.bf16.msra.mxu0 %v1269_v59  ;;  %1229 = vmatpush3.bf16.msra.mxu1 %v1269_v59  ;;  %v1064_v59 = vpack.c.bf16 %v335_v52, %v334_v51  ;;  %v1067_v1 = vpack.c.bf16 %v337_v62, %v336_v60 }
  0x5a   :  { %1191 = vmatprep.subr.bf16.mxu0 %v1270_v11  ;;  %1222 = vmatprep.subr.bf16.mxu1 %v1270_v11 }
  0x5b   :  { %1145 = vmatprep.mubr.bf16.mxu0 %v1697_v12  ;;  %1177 = vmatprep.mubr.msk.bf16.mxu1 %vm1051_vm1, %v1052_v13 }
  0x5d   :  { %1192 = vmatpush3.bf16.msra.mxu0 %v1270_v11  ;;  %1230 = vmatpush3.bf16.msra.mxu1 %v1270_v11 }
  0x5e   :  { %1193 = vmatprep.subr.bf16.mxu0 %v1271_v29  ;;  %1223 = vmatprep.subr.bf16.mxu1 %v1271_v29 }
  0x60   :  { %1146 = vmatmul.mubr.bf16.gmra.mrb[4].mxu0 %v1711_v35  ;;  %1178 = vmatmul.mubr.msk.bf16.gmra.mrb[4].mxu1 %vm1054_vm2, %v1055_v36 }
  0x61   :  { %1194 = vmatpush3.bf16.msra.mxu0 %v1271_v29  ;;  %1231 = vmatpush3.bf16.msra.mxu1 %v1271_v29 }
  0x62   :  { %1195 = vmatprep.subr.bf16.mxu0 %v1272_v39  ;;  %1224 = vmatprep.subr.bf16.mxu1 %v1272_v39 }
  0x63   :  { %1149 = vmatprep.mubr.bf16.mxu0 %v77_v41  ;;  %1181 = vmatprep.mubr.msk.bf16.mxu1 %vm1057_vm3, %v1058_v42 }
  0x65   :  { %1196 = vmatpush3.bf16.msra.mxu0 %v1272_v39  ;;  %1232 = vmatpush3.bf16.msra.mxu1 %v1272_v39 }
  0x66   :  { %1197 = vmatprep.subr.bf16.mxu0 %v1273_v50  ;;  %1225 = vmatprep.subr.bf16.mxu1 %v1273_v50 }
  0x68   :  { %1150 = vmatmul.mubr.bf16.gmra.mrb[8].mxu0 %v78_v53  ;;  %1182 = vmatmul.mubr.msk.bf16.gmra.mrb[8].mxu1 %vm1060_vm4, %v1061_v54 }
  0x69   :  { %1198 = vmatpush3.bf16.msra.mxu0 %v1273_v50  ;;  %1233 = vmatpush3.bf16.msra.mxu1 %v1273_v50 }
  0x6a   :  { %1199 = vmatprep.subr.bf16.mxu0 %v1274_v57  ;;  %1226 = vmatprep.subr.bf16.mxu1 %v1274_v57 }
  0x6b   :  { %1153 = vmatprep.mubr.bf16.mxu0 %v79_v58  ;;  %1185 = vmatprep.mubr.msk.bf16.mxu1 %vm1063_vm6, %v1064_v59 }
  0x6d   :  { %1200 = vmatpush3.bf16.msra.mxu0 %v1274_v57  ;;  %1234 = vmatpush3.bf16.msra.mxu1 %v1274_v57 }
  0x6e   :  { %1201 = vmatprep.subr.bf16.mxu0 %v1275_v63  ;;  %1227 = vmatprep.subr.bf16.mxu1 %v1275_v63 }
  0x70   :  { %1154 = vmatmul.mubr.bf16.gmra.mrb[12].mxu0 %v80_v0  ;;  %1186 = vmatmul.mubr.msk.bf16.gmra.mrb[12].mxu1 %vm1066_vm7, %v1067_v1 }
  0x71   :  { %1202 = vmatpush3.bf16.msra.mxu0 %v1275_v63  ;;  %1235 = vmatpush3.bf16.msra.mxu1 %v1275_v63 }
  0x72   :  { %1203 = vmatprep.subr.bf16.mxu0 %v1276_v2  ;;  %1228 = vmatprep.subr.bf16.mxu1 %v1276_v2 }
  0x73   :  { %1205 = vmatprep.mubr.bf16.mxu0 %v1578_v7  ;;  %1213 = vmatprep.mubr.bf16.mxu1 %v77_v41 }
  0x75   :  { %1204 = vmatpush3.bf16.msra.mxu0 %v1276_v2  ;;  %1236 = vmatpush3.bf16.msra.mxu1 %v1276_v2 }
  0x78   :  { %1206 = vmatmul.mubr.bf16.vlgmr.msra.gmra.mrb[16].mxu0 %v1681_v61  ;;  %1214 = vmatmul.mubr.bf16.vlgmr.msra.gmra.mrb[8].mxu1 %v78_v53 }
  0x79   :  { %1209 = vmatprep.mubr.bf16.mxu0 %v1697_v12  ;;  %1217 = vmatprep.mubr.bf16.mxu1 %v79_v58 }
  0x80   :  { %1210 = vmatmul.mubr.bf16.gmra.mrb[20].mxu0 %v1711_v35  ;;  %1218 = vmatmul.mubr.bf16.gmra.mrb[12].mxu1 %v80_v0 }
 0x12b   :  { %v1752_v3 = vpop.f32.mrb[0].mxu0  ;;  %v1754_v9 = vpop.f32.mrb[0].mxu1 }
 0x12c   :  { %v1756_v10 = vpop.f32.mrb[1].mxu0  ;;  %v1760_v7 = vmul.f32 %v1752_v3, %v1574_v6  ;;  %v1762_v11 = vpop.f32.mrb[1].mxu1  ;;  %vm461_vm8 = vcmp.gt.f32.partialorder %v1752_v3, 0.0  ;;  %1309 = vrcp.f32 %v1752_v3 }
 0x12d   :  { %v1766_v61 = vpop.f32.mrb[2].mxu0  ;;  %v1770_v12 = vmul.f32 %v1756_v10, %v1570_v4  ;;  %v1772_v13 = vpop.f32.mrb[2].mxu1  ;;  %vm459_vm9 = vcmp.gt.f32.partialorder %v1756_v10, 0.0  ;;  %1311 = vrcp.f32 %v1756_v10  ;;  %v493_v19 = vsel %vm461_vm8, %v1752_v3, 1.0 }
 0x12e   :  { %2179 = vst [vmem:[#allocation12_spill] sm:$0xff] %v1760_v7  ;;  %752 = vadd.xlane.f32.xlu1 %v1760_v7  ;;  %v1777_v6 = vpop.f32.mrb[3].mxu0  ;;  %v1779_v18 = vpop.f32.mrb[3].mxu1  ;;  %vm462_vm10 = vcmp.gt.f32.partialorder %v1766_v61, 0.0  ;;  %1313 = vrcp.f32 %v1766_v61  ;;  %v1794_v20 = vmul.f32 %v1766_v61, %v1582_v8  ;;  %v491_v21 = vsel %vm459_vm9, %v1756_v10, 1.0 }
 0x12f   :  { %2180 = vst [vmem:[#allocation13_spill] sm:$0xff] %v1770_v12  ;;  %748 = vadd.xlane.f32.xlu0 %v1770_v12  ;;  %v494_v4 = vsel %vm462_vm10, %v1766_v61, 1.0  ;;  %vm460_vm11 = vcmp.gt.f32.partialorder %v1777_v6, 0.0  ;;  %1315 = vrcp.f32 %v1777_v6  ;;  %v1801_v22 = vmul.f32 %v1777_v6, %v1572_v5 }
 0x130   :  { %2181 = vst [vmem:[#allocation14_spill] sm:$0xff] %v1794_v20  ;;  %1317 = vlog2.f32 %v493_v19  ;;  %v492_v27 = vsel %vm460_vm11, %v1777_v6, 1.0 }
 0x131   :  { %2182 = vst [vmem:[#allocation15_spill] sm:$0xff] %v1801_v22  ;;  %1319 = vlog2.f32 %v494_v4 }
 0x132   :  { %754 = vadd.xlane.f32.xlu1 %v1794_v20  ;;  %1321 = vlog2.f32 %v491_v21 }
 0x133   :  { %750 = vadd.xlane.f32.xlu0 %v1801_v22  ;;  %v1808_v8 = vpop.f32.mrb[4].mxu0  ;;  %v1810_v28 = vpop.f32.mrb[4].mxu1  ;;  %1323 = vlog2.f32 %v492_v27 }
 0x134   :  { %v1812_v29 = vpop.f32.mrb[5].mxu0  ;;  %v1816_v5 = vmul.f32 %v1808_v8, %v1605_v16  ;;  %v1818_v31 = vpop.f32.mrb[5].mxu1  ;;  %vm465_vm12 = vcmp.gt.f32.partialorder %v1808_v8, 0.0  ;;  %1325 = vrcp.f32 %v1808_v8 }
 0x135   :  { %v1822_v32 = vpop.f32.mrb[6].mxu0  ;;  %v1824_v34 = vpop.f32.mrb[6].mxu1  ;;  %vm463_vm13 = vcmp.gt.f32.partialorder %v1812_v29, 0.0  ;;  %1327 = vrcp.f32 %v1812_v29  ;;  %v497_v37 = vsel %vm465_vm12, %v1808_v8, 1.0  ;;  %v1859_v43 = vmul.f32 %v1812_v29, %v1598_v14 }
 0x136   :  { %2183 = vst [vmem:[#allocation16_spill] sm:$0xff] %v1816_v5  ;;  %v1828_v35 = vpop.f32.mrb[7].mxu0  ;;  %v1832_v16 = vmul.f32 %v1822_v32, %v1607_v17  ;;  %v1834_v36 = vpop.f32.mrb[7].mxu1  ;;  %vm466_vm14 = vcmp.gt.f32.partialorder %v1822_v32, 0.0  ;;  %1329 = vrcp.f32 %v1822_v32  ;;  %v495_v41 = vsel %vm463_vm13, %v1812_v29, 1.0 }
 0x137   :  { %2184 = vst [vmem:[#allocation17_spill] sm:$0xff] %v1828_v35  ;;  %v1840_v38 = vpop.eup %1309  ;;  %760 = vadd.xlane.f32.xlu0 %v1816_v5  ;;  %v498_v39 = vsel %vm466_vm14, %v1822_v32, 1.0  ;;  %vm464_vm15 = vcmp.gt.f32.partialorder %v1828_v35, 0.0  ;;  %1331 = vrcp.f32 %v1828_v35  ;;  %2186 = vst [vmem:[#allocation19_spill] sm:$0xff] %v1859_v43  ;;  %v1868_v47 = vmul.f32 %v1828_v35, %v1600_v15 }
 0x138   :  { %2185 = vst [vmem:[#allocation18_spill] sm:$0xff] %v1832_v16  ;;  %v1848_v17 = vpop.eup %1311  ;;  %762 = vadd.xlane.f32.xlu1 %v1832_v16  ;;  %1333 = vlog2.f32 %v497_v37  ;;  %v496_v44 = vsel %vm464_vm15, %v1828_v35, 1.0 }
 0x139   :  { %v1855_v42 = vpop.eup %1313  ;;  %2187 = vst [vmem:[#allocation20_spill] sm:$0xff] %v1868_v47  ;;  %1335 = vlog2.f32 %v498_v39 }
 0x13a   :  { %v1864_v46 = vpop.eup %1315  ;;  %1337 = vlog2.f32 %v495_v41 }
 0x13b   :  { %v1870_v48 = vpop.eup %1317  ;;  %756 = vadd.xlane.f32.xlu0 %v1859_v43  ;;  %v1873_v49 = vpop.f32.mrb[8].mxu0  ;;  %1339 = vlog2.f32 %v496_v44 }
 0x13c   :  { %v1875_v14 = vpop.eup %1319  ;;  %vm469_vm0 = vcmp.gt.f32.partialorder %v1873_v49, 0.0  ;;  %758 = vadd.xlane.f32.xlu1 %v1868_v47  ;;  %v1879_v50 = vpop.f32.mrb[9].mxu0  ;;  %v1883_v15 = vmul.f32 %v1873_v49, %v1628_v25  ;;  %1341 = vrcp.f32 %v1873_v49 }
 0x13d   :  { %v1322_v51 = vpop.eup %1321  ;;  %v501_v52 = vsel %vm469_vm0, %v1873_v49, 1.0  ;;  %vm467_vm1 = vcmp.gt.f32.partialorder %v1879_v50, 0.0  ;;  %v1890_v53 = vpop.f32.mrb[10].mxu0  ;;  %1343 = vrcp.f32 %v1879_v50  ;;  %v1920_v62 = vmul.f32 %v1879_v50, %v1623_v23 }
 0x13e   :  { %2188 = vst [vmem:[#allocation21_spill] sm:$0xff] %v1883_v15  ;;  %v1324_v54 = vpop.eup %1323  ;;  %v499_v25 = vsel %vm467_vm1, %v1879_v50, 1.0  ;;  %vm470_vm2 = vcmp.gt.f32.partialorder %v1890_v53, 0.0  ;;  %v1897_v55 = vpop.f32.mrb[11].mxu0  ;;  %v1901_v56 = vmul.f32 %v1890_v53, %v1630_v26  ;;  %1345 = vlog2.f32 %v501_v52 }
 0x13f   :  { %v1903_v57 = vpop.eup %1325  ;;  %v502_v58 = vsel %vm470_vm2, %v1890_v53, 1.0  ;;  %vm468_vm3 = vcmp.gt.f32.partialorder %v1897_v55, 0.0  ;;  %768 = vadd.xlane.f32.xlu0 %v1883_v15  ;;  %1347 = vlog2.f32 %v499_v25  ;;  %2190 = vst [vmem:[#allocation23_spill] sm:$0xff] %v1920_v62  ;;  %v1927_v0 = vmul.f32 %v1897_v55, %v1625_v24 }
 0x140   :  { %2189 = vst [vmem:[#allocation22_spill] sm:$0xff] %v1901_v56  ;;  %v1910_v59 = vpop.eup %1327  ;;  %v500_v60 = vsel %vm468_vm3, %v1897_v55, 1.0  ;;  %770 = vadd.xlane.f32.xlu1 %v1901_v56  ;;  %1349 = vlog2.f32 %v502_v58 }
 0x141   :  { %v1916_v26 = vpop.eup %1329  ;;  %1351 = vrcp.f32 %v1890_v53  ;;  %2191 = vst [vmem:[#allocation24_spill] sm:$0xff] %v1927_v0 }
 0x142   :  { %v1922_v63 = vpop.eup %1331  ;;  %1353 = vlog2.f32 %v500_v60  ;;  %v512_v60 = vmul.f32 0.6931472, %v1870_v48 }
 0x143   :  { %v1334_v1 = vpop.eup %1333  ;;  %764 = vadd.xlane.f32.xlu0 %v1920_v62  ;;  %v1930_v2 = vpop.f32.mrb[12].mxu0  ;;  %1355 = vrcp.f32 %v1897_v55  ;;  %v1977_v62 = vmul.f32 0.6931472, %v1324_v54 }
 0x144   :  { %v1336_v19 = vpop.eup %1335  ;;  %vm473_vm4 = vcmp.gt.f32.partialorder %v1930_v2, 0.0  ;;  %766 = vadd.xlane.f32.xlu1 %v1927_v0  ;;  %v1935_v23 = vpop.f32.mrb[13].mxu0  ;;  %1357 = vrcp.f32 %v1930_v2  ;;  %v1979_v56 = vmul.f32 0.6931472, %v1334_v1 }
 0x145   :  { %v1338_v4 = vpop.eup %1337  ;;  %v505_v24 = vsel %vm473_vm4, %v1930_v2, 1.0  ;;  %vm471_vm5 = vcmp.gt.f32.partialorder %v1935_v23, 0.0  ;;  %v1942_v21 = vpop.f32.mrb[14].mxu0  ;;  %v1946_v27 = vmul.f32 %v1935_v23, %v1641_v30  ;;  %v1981_v48 = vmul.f32 0.6931472, %v1336_v19 }
 0x146   :  { %v1340_v37 = vpop.eup %1339  ;;  %1359 = vlog2.f32 %v505_v24  ;;  %v503_v39 = vsel %vm471_vm5, %v1935_v23, 1.0  ;;  %vm474_vm6 = vcmp.gt.f32.partialorder %v1942_v21, 0.0  ;;  %v1952_v41 = vpop.f32.mrb[15].mxu0 }
 0x147   :  { %2192 = vst [vmem:[#allocation25_spill] sm:$0xff] %v1946_v27  ;;  %v1342_v44 = vpop.eup %1341  ;;  %1361 = vlog2.f32 %v503_v39  ;;  %v506_v52 = vsel %vm474_vm6, %v1942_v21, 1.0  ;;  %vm472_vm7 = vcmp.gt.f32.partialorder %v1952_v41, 0.0  ;;  %772 = vadd.xlane.f32.xlu0 %v1946_v27  ;;  %v1961_v30 = vmul.f32 %v1952_v41, %v1646_v33 }
 0x148   :  { %v1344_v25 = vpop.eup %1343  ;;  %1363 = vrcp.f32 %v1935_v23  ;;  %v504_v58 = vsel %vm472_vm7, %v1952_v41, 1.0  ;;  %v1971_v39 = vmul.f32 %v1930_v2, %v1656_v40  ;;  %v1974_v33 = vmul.f32 0.6931472, %v1875_v14 }
 0x149   :  { %2193 = vst [vmem:[#allocation26_spill] sm:$0xff] %v1961_v30  ;;  %v1346_v24 = vpop.eup %1345  ;;  %1365 = vlog2.f32 %v506_v52  ;;  %774 = vadd.xlane.f32.xlu1 %v1961_v30  ;;  %v508_v27 = vmul.f32 0.6931472, %v1322_v51  ;;  %v1986_v14 = vmul.f32 %v1942_v21, %v1659_v45  ;;  %v1988_v51 = vmul.f32 0.6931472, %v1338_v4 }
 0x14a   :  { %2194 = vst [vmem:[#allocation27_spill] sm:$0xff] %v1971_v39  ;;  %v1348_v0 = vpop.eup %1347  ;;  %1367 = vrcp.f32 %v1942_v21  ;;  %v1990_v15 = vmul.f32 0.6931472, %v1340_v37  ;;  %v528_v1 = vmul.f32 0.6931472, %v1346_v24 }
 0x14b   :  { %v1350_v52 = vpop.eup %1349  ;;  %1369 = vlog2.f32 %v504_v58  ;;  %v1215_v30 = vpop.f32.mrb[8].mxu1  ;;  %776 = vadd.xlane.f32.xlu0 %v1971_v39  ;;  %2195 = vst [vmem:[#allocation28_spill] sm:$0xff] %v1986_v14  ;;  %v524_v5 = vmul.f32 0.6931472, %v1348_v0 }
 0x14c   :  { %v1207_v40 = vpop.f32.mrb[16].mxu0  ;;  %v1352_v54 = vpop.eup %1351  ;;  %1371 = vrcp.f32 %v1952_v41  ;;  %v694_v19 = vmul.f32 %v1342_v44, %v1215_v30  ;;  %v530_v45 = vmul.f32 0.6931472, %v1350_v52 }
 0x14d   :  { %v630_v47 = vadd.f32 %v1207_v40, %v1754_v9  ;;  %v621_v58 = vpop.f32.mrb[17].mxu0  ;;  %v653_v43 = vpop.f32.mrb[9].mxu1  ;;  %778 = vadd.xlane.f32.xlu1 %v1986_v14 }
 0x14e   :  { %v1354_v16 = vpop.eup %1353  ;;  %v622_v39 = vadd.f32 %v621_v58, %v1762_v11  ;;  %v692_v22 = vmul.f32 %v1344_v25, %v653_v43  ;;  %v1216_v20 = vpop.f32.mrb[10].mxu1  ;;  %v710_v12 = vsub.f32 %v528_v1, %v694_v19 }
 0x14f   :  { %v1208_v4 = vpop.f32.mrb[18].mxu0  ;;  %v1356_v37 = vpop.eup %1355  ;;  %v686_v7 = vmul.f32 %v1840_v38, %v630_v47  ;;  %v695_v24 = vmul.f32 %v1352_v54, %v1216_v20  ;;  %v526_v0 = vmul.f32 0.6931472, %v1354_v16 }
 0x150   :  { %v633_v44 = vadd.f32 %v1208_v4, %v1772_v13  ;;  %v624_v9 = vpop.f32.mrb[19].mxu0  ;;  %v656_v30 = vpop.f32.mrb[11].mxu1  ;;  %v684_v35 = vmul.f32 %v1848_v17, %v622_v39  ;;  %v708_v11 = vsub.f32 %v524_v5, %v692_v22  ;;  %v2004_v47 = vsel %vm469_vm0, %v710_v12, 0.0 }
 0x151   :  { %v1358_v40 = vpop.eup %1357  ;;  %v625_v43 = vadd.f32 %v624_v9, %v1779_v18  ;;  %v711_v52 = vsub.f32 %v530_v45, %v695_v24  ;;  %v693_v14 = vmul.f32 %v1356_v37, %v656_v30  ;;  %v702_v1 = vsub.f32 %v512_v60, %v686_v7 }
 0x152   :  { %v1360_v25 = vpop.eup %1359  ;;  %v687_v58 = vmul.f32 %v1855_v42, %v633_v44  ;;  %v700_v13 = vsub.f32 %v508_v27, %v684_v35  ;;  %v2022_v3 = vsel %vm467_vm1, %v708_v11, 0.0  ;;  %vm975_vm0 = vcmask 654912  }
 0x153   :  { %v1362_v19 = vpop.eup %1361  ;;  %v685_v20 = vmul.f32 %v1864_v46, %v625_v43  ;;  %v536_v38 = vmul.f32 0.6931472, %v1360_v25  ;;  %v709_v22 = vsub.f32 %v526_v0, %v693_v14  ;;  %v2008_v18 = vsel %vm461_vm8, %v702_v1, 0.0  ;;  %v1211_v7 = vpop.f32.mrb[20].mxu0 }
 0x154   :  { %v1364_v17 = vpop.eup %1363  ;;  %v532_v5 = vmul.f32 0.6931472, %v1362_v19  ;;  %v703_v16 = vsub.f32 %v1974_v33, %v687_v58  ;;  %v1219_v60 = vpop.f32.mrb[12].mxu1  ;;  %v2013_v46 = vsel %vm459_vm9, %v700_v13, 0.0  ;;  %v2018_v12 = vsel %vm470_vm2, %v711_v52, 0.0 }
 0x155   :  { %v1366_v42 = vpop.eup %1365  ;;  %v701_v35 = vsub.f32 %v1977_v62, %v685_v20  ;;  %v646_v27 = vadd.f32 %v1211_v7, %v1810_v28  ;;  %v698_v39 = vmul.f32 %v1358_v40, %v1219_v60  ;;  %v637_v33 = vpop.f32.mrb[21].mxu0  ;;  %v2036_v28 = vsel %vm468_vm3, %v709_v22, 0.0  ;;  %v2198_v7 = vld [vmem:[#allocation13_spill] sm:$0xff] }
 0x156   :  { %v1368_v49 = vpop.eup %1367  ;;  %v669_v14 = vpop.f32.mrb[13].mxu1  ;;  %v538_v54 = vmul.f32 0.6931472, %v1366_v42  ;;  %v2027_v10 = vsel %vm462_vm10, %v703_v16, 0.0  ;;  %v638_v53 = vadd.f32 %v637_v33, %v1818_v31  ;;  %vm919_vm8 = vcmask 130112  }
 0x157   :  { %v1370_v62 = vpop.eup %1369  ;;  %v696_v45 = vmul.f32 %v1364_v17, %v669_v14  ;;  %v1212_v4 = vpop.f32.mrb[22].mxu0  ;;  %v2032_v50 = vsel %vm460_vm11, %v701_v35, 0.0  ;;  %v690_v44 = vmul.f32 %v1903_v57, %v646_v27  ;;  %v714_v61 = vsub.f32 %v536_v38, %v698_v39  ;;  %v2197_v17 = vld [vmem:[#allocation12_spill] sm:$0xff]  ;;  %v2199_v27 = vld [vmem:[#allocation14_spill] sm:$0xff] }
 0x158   :  { %v1220_v37 = vpop.f32.mrb[14].mxu1  ;;  %v1372_v24 = vpop.eup %1371  ;;  %v649_v9 = vadd.f32 %v1212_v4, %v1824_v34  ;;  %v688_v11 = vmul.f32 %v1910_v59, %v638_v53  ;;  %v534_v0 = vmul.f32 0.6931472, %v1370_v62  ;;  %v2200_v53 = vld [vmem:[#allocation15_spill] sm:$0xff]  ;;  %vm926_vm9 = vcmask 195712  }
 0x159   :  { %v699_v30 = vmul.f32 %v1368_v49, %v1220_v37  ;;  %v640_v40 = vpop.f32.mrb[23].mxu0  ;;  %v672_v31 = vpop.f32.mrb[15].mxu1  ;;  %v712_v43 = vsub.f32 %v532_v5, %v696_v45  ;;  %v706_v58 = vsub.f32 %v1979_v56, %v690_v44  ;;  %v2052_v59 = vsel %vm473_vm4, %v714_v61, 0.0 }
 0x15a   :  { %v641_v6 = vadd.f32 %v640_v40, %v1834_v36  ;;  %v691_v25 = vmul.f32 %v1916_v26, %v649_v9  ;;  %v697_v52 = vmul.f32 %v1372_v24, %v672_v31  ;;  %v704_v1 = vsub.f32 %v1988_v51, %v688_v11  ;;  %v2201_v24 = vld [vmem:[#allocation16_spill] sm:$0xff] }
 0x15b   :  { %v715_v55 = vsub.f32 %v538_v54, %v699_v30  ;;  %v2048_v34 = vsel %vm471_vm5, %v712_v43, 0.0  ;;  %v722_v26 = vsel %vm465_vm12, %v706_v58, 0.0  ;;  %v2202_v30 = vld [vmem:[#allocation18_spill] sm:$0xff]  ;;  %v2203_v43 = vld [vmem:[#allocation19_spill] sm:$0xff]  ;;  %vm933_vm10 = vcmask 261312  }
 0x15c   :  { %v689_v57 = vmul.f32 %v1922_v63, %v641_v6  ;;  %v713_v36 = vsub.f32 %v534_v0, %v697_v52  ;;  %v707_v19 = vsub.f32 %v1981_v48, %v691_v25  ;;  %v720_v63 = vsel %vm463_vm13, %v704_v1, 0.0  ;;  %v2204_v25 = vld [vmem:[#allocation20_spill] sm:$0xff] }
 0x15d   :  { %v2059_v56 = vsel %vm474_vm6, %v715_v55, 0.0  ;;  %vm940_vm11 = vcmask 326912   ;;  %vm947_vm12 = vcmask 392512   ;;  %vm954_vm13 = vcmask 458112  }
 0x15e   :  { %v705_v23 = vsub.f32 %v1990_v15, %v689_v57  ;;  %v723_v2 = vsel %vm466_vm14, %v707_v19, 0.0  ;;  %v2068_v51 = vsel %vm472_vm7, %v713_v36, 0.0  ;;  %v2205_v36 = vld [vmem:[#allocation21_spill] sm:$0xff]  ;;  %vm961_vm14 = vcmask 523712  }
 0x15f   :  { %vm982_vm1 = vcmask 720512   ;;  %vm989_vm2 = vcmask 786112   ;;  %vm996_vm3 = vcmask 851712   ;;  %vm1003_vm4 = vcmask 917312  }
 0x160   :  { %v2072_v20 = vsel %vm464_vm15, %v705_v23, 0.0  ;;  %v2206_v23 = vld [vmem:[#allocation22_spill] sm:$0xff]  ;;  %vm968_vm15 = vcmask 589312   ;;  %vm1010_vm5 = vcmask 982912   ;;  %vm1017_vm6 = vcmask 1048512  }
 0x1bb   :  { %v753_v48 = vpop.xlane.xlu1 %752 }
 0x1bc   :  { %1373 = vrcp.f32 %v753_v48  ;;  %v749_v21 = vpop.xlane.xlu0 %748 }
 0x1bd   :  { %1375 = vrcp.f32 %v749_v21 }
 0x1bf   :  { %v755_v38 = vpop.xlane.xlu1 %754 }
 0x1c0   :  { %1377 = vrcp.f32 %v755_v38  ;;  %v751_v29 = vpop.xlane.xlu0 %750  ;;  %v2207_v38 = vld [vmem:[#allocation23_spill] sm:$0xff] }
 0x1c1   :  { %1379 = vrcp.f32 %v751_v29 }
 0x1c4   :  { %v761_v15 = vpop.xlane.xlu0 %760 }
 0x1c5   :  { %1381 = vrcp.f32 %v761_v15  ;;  %v763_v32 = vpop.xlane.xlu1 %762 }
 0x1c6   :  { %v1374_v13 = vpop.eup %1373  ;;  %1383 = vrcp.f32 %v763_v32  ;;  %v2208_v32 = vld [vmem:[#allocation24_spill] sm:$0xff] }
 0x1c7   :  { %v1376_v41 = vpop.eup %1375  ;;  %v814_v22 = vmul.f32 %v1374_v13, %v2197_v17 }
 0x1c8   :  { %v757_v5 = vpop.xlane.xlu0 %756  ;;  %v812_v60 = vmul.f32 %v1376_v41, %v2198_v7 }
 0x1c9   :  { %1385 = vrcp.f32 %v757_v5  ;;  %v759_v16 = vpop.xlane.xlu1 %758  ;;  %v830_v42 = vmul.f32 %v814_v22, %v2008_v18 }
 0x1ca   :  { %v1378_v35 = vpop.eup %1377  ;;  %1387 = vrcp.f32 %v759_v16  ;;  %v828_v62 = vmul.f32 %v812_v60, %v2013_v46 }
 0x1cb   :  { %v1380_v49 = vpop.eup %1379  ;;  %848 = vadd.xlane.f32.xlu0 %v830_v42  ;;  %v815_v39 = vmul.f32 %v1378_v35, %v2199_v27  ;;  %v2210_v42 = vld [vmem:[#allocation26_spill] sm:$0xff]  ;;  %v2211_v35 = vld [vmem:[#allocation27_spill] sm:$0xff] }
 0x1cc   :  { %v769_v33 = vpop.xlane.xlu0 %768  ;;  %v813_v45 = vmul.f32 %v1380_v49, %v2200_v53 }
 0x1cd   :  { %1389 = vrcp.f32 %v769_v33  ;;  %v771_v14 = vpop.xlane.xlu1 %770  ;;  %v831_v54 = vmul.f32 %v815_v39, %v2027_v10  ;;  %v2212_v39 = vld [vmem:[#allocation28_spill] sm:$0xff] }
 0x1ce   :  { %1391 = vrcp.f32 %v771_v14  ;;  %v829_v9 = vmul.f32 %v813_v45, %v2032_v50 }
 0x1cf   :  { %v1382_v4 = vpop.eup %1381  ;;  %850 = vadd.xlane.f32.xlu1 %v831_v54  ;;  %844 = vadd.xlane.f32.xlu0 %v828_v62 }
 0x1d0   :  { %v1384_v18 = vpop.eup %1383  ;;  %v765_v37 = vpop.xlane.xlu0 %764  ;;  %v818_v44 = vmul.f32 %v1382_v4, %v2201_v24 }
 0x1d1   :  { %1393 = vrcp.f32 %v765_v37  ;;  %v767_v61 = vpop.xlane.xlu1 %766  ;;  %v819_v40 = vmul.f32 %v1384_v18, %v2202_v30 }
 0x1d2   :  { %1395 = vrcp.f32 %v767_v61  ;;  %v834_v10 = vmul.f32 %v818_v44, %v722_v26 }
 0x1d3   :  { %v1386_v31 = vpop.eup %1385  ;;  %846 = vadd.xlane.f32.xlu1 %v829_v9  ;;  %v835_v0 = vmul.f32 %v819_v40, %v723_v2 }
 0x1d4   :  { %v1388_v46 = vpop.eup %1387  ;;  %v773_v11 = vpop.xlane.xlu0 %772  ;;  %856 = vadd.xlane.f32.xlu0 %v834_v10  ;;  %v816_v6 = vmul.f32 %v1386_v31, %v2203_v43 }
 0x1d5   :  { %1397 = vrcp.f32 %v773_v11  ;;  %v817_v55 = vmul.f32 %v1388_v46, %v2204_v25 }
 0x1d6   :  { %v775_v52 = vpop.xlane.xlu1 %774  ;;  %v832_v58 = vmul.f32 %v816_v6, %v720_v63 }
 0x1d7   :  { %v1390_v57 = vpop.eup %1389  ;;  %1399 = vrcp.f32 %v775_v52  ;;  %858 = vadd.xlane.f32.xlu1 %v835_v0  ;;  %v833_v19 = vmul.f32 %v817_v55, %v2072_v20  ;;  %v2209_v20 = vld [vmem:[#allocation25_spill] sm:$0xff] }
 0x1d8   :  { %v1392_v50 = vpop.eup %1391  ;;  %v777_v1 = vpop.xlane.xlu0 %776  ;;  %852 = vadd.xlane.f32.xlu0 %v832_v58  ;;  %v822_v26 = vmul.f32 %v1390_v57, %v2205_v36 }
 0x1d9   :  { %1401 = vrcp.f32 %v777_v1  ;;  %v823_v8 = vmul.f32 %v1392_v50, %v2206_v23 }
 0x1da   :  { %v779_v48 = vpop.xlane.xlu1 %778  ;;  %v838_v2 = vmul.f32 %v822_v26, %v2004_v47 }
 0x1db   :  { %v1394_v21 = vpop.eup %1393  ;;  %1403 = vrcp.f32 %v779_v48  ;;  %854 = vadd.xlane.f32.xlu1 %v833_v19  ;;  %v839_v15 = vmul.f32 %v823_v8, %v2018_v12 }
 0x1dc   :  { %v1396_v63 = vpop.eup %1395  ;;  %864 = vadd.xlane.f32.xlu0 %v838_v2  ;;  %v820_v29 = vmul.f32 %v1394_v21, %v2207_v38 }
 0x1dd   :  { %v821_v13 = vmul.f32 %v1396_v63, %v2208_v32 }
 0x1de   :  { %v836_v41 = vmul.f32 %v820_v29, %v2022_v3 }
 0x1df   :  { %v1398_v17 = vpop.eup %1397  ;;  %866 = vadd.xlane.f32.xlu1 %v839_v15  ;;  %v837_v47 = vmul.f32 %v821_v13, %v2036_v28 }
 0x1e0   :  { %860 = vadd.xlane.f32.xlu0 %v836_v41  ;;  %v824_v22 = vmul.f32 %v1398_v17, %v2209_v20 }
 0x1e1   :  { %v1400_v5 = vpop.eup %1399 }
 0x1e2   :  { %v840_v16 = vmul.f32 %v824_v22, %v2048_v34  ;;  %v825_v7 = vmul.f32 %v1400_v5, %v2210_v42  ;;  %v908_v34 = vlaneseq }
 0x1e3   :  { %v1402_v60 = vpop.eup %1401  ;;  %862 = vadd.xlane.f32.xlu1 %v837_v47 }
 0x1e4   :  { %868 = vadd.xlane.f32.xlu0 %v840_v16  ;;  %v841_v12 = vmul.f32 %v825_v7, %v2068_v51  ;;  %v826_v49 = vmul.f32 %v1402_v60, %v2211_v35  ;;  %v2103_v54 = vand.u32 127, %v908_v34  ;;  %v2106_v45 = vshrl.u32 %v908_v34, 7 }
 0x1e5   :  { %v1404_v3 = vpop.eup %1403 }
 0x1e6   :  { %v842_v27 = vmul.f32 %v826_v49, %v2052_v59  ;;  %v827_v33 = vmul.f32 %v1404_v3, %v2212_v39  ;;  %v914_v62 = vadd.s32 4294967288, %v2103_v54  ;;  %v921_v4 = vadd.s32 4294967280, %v2103_v54 }
 0x1e7   :  { %870 = vadd.xlane.f32.xlu1 %v841_v12  ;;  %v912_v59 = vsub.s32 %v2103_v54, %v2106_v45  ;;  %v935_v24 = vadd.s32 4294967264, %v2103_v54  ;;  %v928_v44 = vadd.s32 4294967272, %v2103_v54  ;;  %v942_v46 = vadd.s32 4294967256, %v2103_v54 }
 0x1e8   :  { %872 = vadd.xlane.f32.xlu0 %v842_v27  ;;  %v843_v28 = vmul.f32 %v827_v33, %v2059_v56  ;;  %v917_v37 = vsub.s32 %v914_v62, %v2106_v45  ;;  %v924_v30 = vsub.s32 %v921_v4, %v2106_v45  ;;  %v949_v58 = vadd.s32 4294967248, %v2103_v54 }
 0x1e9   :  { %v938_v43 = vsub.s32 %v935_v24, %v2106_v45  ;;  %v931_v6 = vsub.s32 %v928_v44, %v2106_v45  ;;  %v956_v50 = vadd.s32 4294967240, %v2103_v54  ;;  %v945_v1 = vsub.s32 %v942_v46, %v2106_v45 }
 0x1ea   :  { %v963_v23 = vadd.s32 4294967232, %v2103_v54  ;;  %v952_v21 = vsub.s32 %v949_v58, %v2106_v45  ;;  %v977_v15 = vadd.s32 4294967216, %v2103_v54  ;;  %v970_v32 = vadd.s32 4294967224, %v2103_v54 }
 0x1eb   :  { %874 = vadd.xlane.f32.xlu1 %v843_v28  ;;  %v959_v13 = vsub.s32 %v956_v50, %v2106_v45  ;;  %v984_v47 = vadd.s32 4294967208, %v2103_v54  ;;  %v991_v60 = vadd.s32 4294967200, %v2103_v54  ;;  %v998_v49 = vadd.s32 4294967192, %v2103_v54 }
 0x1ec   :  { %v966_v20 = vsub.s32 %v963_v23, %v2106_v45  ;;  %v980_v12 = vsub.s32 %v977_v15, %v2106_v45  ;;  %v973_v35 = vsub.s32 %v970_v32, %v2106_v45  ;;  %v1005_v28 = vadd.s32 4294967184, %v2103_v54 }
 0x1ed   :  { %v994_v4 = vsub.s32 %v991_v60, %v2106_v45  ;;  %v1012_v24 = vadd.s32 4294967176, %v2103_v54 }
 0x1ef   :  { %v1015_v54 = vsub.s32 %v1012_v24, %v2106_v45 }
 0x258   :  { %v849_v14 = vpop.xlane.xlu0 %848 }
 0x259   :  { %v878_v40 = vmul.f32 0.36067376, %v849_v14  ;;  %v987_v14 = vsub.s32 %v984_v47, %v2106_v45 }
 0x25b   :  { %v925_v52 = vrot.slane %v878_v40, %v924_v30  ;;  %v1008_v30 = vsub.s32 %v1005_v28, %v2106_v45 }
 0x25c   :  { %v851_v53 = vpop.xlane.xlu1 %850  ;;  %v845_v51 = vpop.xlane.xlu0 %844 }
 0x25d   :  { %v876_v18 = vmul.f32 0.36067376, %v845_v51  ;;  %v879_v0 = vmul.f32 0.36067376, %v851_v53 }
 0x25f   :  { %v913_v10 = vrot.slane %v876_v18, %v912_v59  ;;  %v932_v8 = vrot.slane %v879_v0, %v931_v6 }
 0x260   :  { %v847_v56 = vpop.xlane.xlu1 %846 }
 0x261   :  { %v877_v61 = vmul.f32 0.36067376, %v847_v56  ;;  %v857_v9 = vpop.xlane.xlu0 %856  ;;  %v1001_v56 = vsub.s32 %v998_v49, %v2106_v45 }
 0x262   :  { %v882_v63 = vmul.f32 0.36067376, %v857_v9 }
 0x263   :  { %v918_v31 = vrot.slane %v877_v61, %v917_v37 }
 0x264   :  { %v859_v11 = vpop.xlane.xlu1 %858  ;;  %v953_v42 = vrot.slane %v882_v63, %v952_v21 }
 0x265   :  { %v920_v25 = vsel %vm919_vm8, %v918_v31, %v913_v10  ;;  %v853_v55 = vpop.xlane.xlu0 %852  ;;  %v883_v22 = vmul.f32 0.36067376, %v859_v11 }
 0x266   :  { %v880_v57 = vmul.f32 0.36067376, %v853_v55  ;;  %v927_v36 = vsel %vm926_vm9, %v925_v52, %v920_v25 }
 0x267   :  { %v934_v38 = vsel %vm933_vm10, %v932_v8, %v927_v36  ;;  %v960_v34 = vrot.slane %v883_v22, %v959_v13 }
 0x268   :  { %v939_v26 = vrot.slane %v880_v57, %v938_v43  ;;  %v855_v19 = vpop.xlane.xlu1 %854 }
 0x269   :  { %v881_v48 = vmul.f32 0.36067376, %v855_v19  ;;  %v865_v2 = vpop.xlane.xlu0 %864 }
 0x26a   :  { %v941_v41 = vsel %vm940_vm11, %v939_v26, %v934_v38  ;;  %v886_v27 = vmul.f32 0.36067376, %v865_v2 }
 0x26b   :  { %v946_v29 = vrot.slane %v881_v48, %v945_v1 }
 0x26c   :  { %v867_v17 = vpop.xlane.xlu1 %866  ;;  %v981_v44 = vrot.slane %v886_v27, %v980_v12 }
 0x26d   :  { %v948_v5 = vsel %vm947_vm12, %v946_v29, %v941_v41  ;;  %v861_v16 = vpop.xlane.xlu0 %860  ;;  %v887_v62 = vmul.f32 0.36067376, %v867_v17 }
 0x26e   :  { %v884_v7 = vmul.f32 0.36067376, %v861_v16  ;;  %v955_v3 = vsel %vm954_vm13, %v953_v42, %v948_v5 }
 0x26f   :  { %v962_v18 = vsel %vm961_vm14, %v960_v34, %v955_v3  ;;  %v988_v40 = vrot.slane %v887_v62, %v987_v14 }
 0x270   :  { %v967_v39 = vrot.slane %v884_v7, %v966_v20  ;;  %v863_v33 = vpop.xlane.xlu1 %862 }
 0x271   :  { %v885_v53 = vmul.f32 0.36067376, %v863_v33  ;;  %v869_v51 = vpop.xlane.xlu0 %868 }
 0x272   :  { %v888_v59 = vmul.f32 0.36067376, %v869_v51  ;;  %v969_v61 = vsel %vm968_vm15, %v967_v39, %v962_v18 }
 0x273   :  { %v974_v37 = vrot.slane %v885_v53, %v973_v35 }
 0x274   :  { %v871_v9 = vpop.xlane.xlu1 %870  ;;  %v995_v43 = vrot.slane %v888_v59, %v994_v4 }
 0x275   :  { %v976_v10 = vsel %vm975_vm0, %v974_v37, %v969_v61  ;;  %v889_v31 = vmul.f32 0.36067376, %v871_v9  ;;  %v873_v46 = vpop.xlane.xlu0 %872 }
 0x276   :  { %v983_v11 = vsel %vm982_vm1, %v981_v44, %v976_v10  ;;  %v890_v6 = vmul.f32 0.36067376, %v873_v46 }
 0x277   :  { %v990_v0 = vsel %vm989_vm2, %v988_v40, %v983_v11  ;;  %v1002_v25 = vrot.slane %v889_v31, %v1001_v56 }
 0x278   :  { %v997_v55 = vsel %vm996_vm3, %v995_v43, %v990_v0  ;;  %v1009_v52 = vrot.slane %v890_v6, %v1008_v30  ;;  %v875_v58 = vpop.xlane.xlu1 %874 }
 0x279   :  { %v1004_v57 = vsel %vm1003_vm4, %v1002_v25, %v997_v55  ;;  %v891_v50 = vmul.f32 0.36067376, %v875_v58 }
 0x27a   :  { %v1011_v36 = vsel %vm1010_vm5, %v1009_v52, %v1004_v57 }
 0x27b   :  { %v1016_v1 = vrot.slane %v891_v50, %v1015_v54 }
 0x27d   :  { %v1018_v26 = vsel %vm1017_vm6, %v1016_v1, %v1011_v36 }
 0x27e   :  { %1020 = vst [vmem:[#allocation8] sm:$0x1] %v1018_v26 }
 0x27f   :  { %1482 = shalt.err (!%p1479_p0)
}
 0x280   :  { %s1483_s28 = scalar_lea.hbm %s2157_s3, 16 }
 0x281   :  { %p1484_p1 = scmp.ne.s32.totalorder %s2157_s3, %s1483_s28  ;;  %p1487_p2 = scmp.lt.u32.totalorder %s1483_s28, %s2157_s3 }
 0x283   :  { %p1489_p3 = pnand %p1487_p2, %p1484_p1 }
 0x285   :  { %1492 = shalt.err (!%p1489_p3)
}
 0x286   :  { %1030 = dma.vmem_to_hbm [thread:$0]  %s1028_s23, 16, %s2157_s3, [#allocation4]  }
 0x287   :  { %1497 = dma.done.wait [#allocation4], 16  }
 0x288   :  { %1498 = vsyncadd [#allocation4], 4294967280 }
 0x289   :  { %1034 = vsyncpa [#allocation3], 1 }
 0x28a   :  { %1035 = vsyncpa [#allocation6], 1 }
 0x28b   :  { %1036 = vsyncpa [#allocation4], 1 }

// kernel: tpu_custom_call.1
= control target key start
LH: loop header
LB: loop body
LE: loop exit
PB: predicated region body
PF: predicated region fallthrough
CT: control target
= control target key end

     0   :  { %8 = vsyncpa [#allocation3], 0  ;;  %s2154_s0 = inlined_call_operand.hbm [shape: bf16[128,128], index: 0, kind: input, shape index: {}]   ;;  %s2155_s1 = inlined_call_operand.hbm [shape: bf16[128,128], index: 1, kind: input, shape index: {}]   ;;  %s2156_s2 = inlined_call_operand.hbm [shape: f32[128,128], index: 2, kind: input, shape index: {}]   ;;  %s2157_s3 = inlined_call_operand.hbm [shape: f32[1,128], index: 3, kind: output, shape index: {}]  }
   0x1   :  { %9 = vsyncpa [#allocation6], 0 }
   0x2   :  { %10 = vsyncpa [#allocation4], 0  ;;  %s1499_s12 = smov [#allocation5]   ;;  %s1500_s14 = smov [#allocation2]  }
   0x3   :  { %s28_s13 = sshll.u32 %s1499_s12, 4  ;;  %s16_s15 = sshll.u32 %s1500_s14, 4  ;;  %s29_s13 = int_to_ptr.vmem [resolvable:$true] %s28_s13  ;;  %s1527_s15 = int_to_ptr.vmem [resolvable:$true] %s16_s15 }
   0x4   :  { %s1405_s18 = scalar_lea.hbm %s2155_s1, 1024 }
   0x5   :  { %p1406_p0 = scmp.ne.s32.totalorder %s2155_s1, %s1405_s18  ;;  %p1409_p1 = scmp.lt.u32.totalorder %s1405_s18, %s2155_s1 }
   0x7   :  { %p1411_p2 = pnand %p1409_p1, %p1406_p0 }
   0x9   :  { %1414 = shalt.err (!%p1411_p2)
}
   0xa   :  { %s1415_s23 = scalar_lea.vmem %s29_s13, 1024  ;;  %p1420_p4 = scmp.lt.s32.totalorder %s29_s13, %s29_s13 }
   0xb   :  { %p1416_p3 = scmp.ne.s32.totalorder %s29_s13, %s1415_s23  ;;  %p1421_p5 = scmp.lt.s32.totalorder %s1415_s23, %s1415_s23 }
   0xd   :  { %p1422_p6 = por %p1421_p5, %p1420_p4 }
   0xf   :  { %p1423_p7 = pnand %p1422_p6, %p1416_p3 }
  0x11   :  { %1426 = shalt.err (!%p1423_p7)
}
  0x12   :  { %s1501_s24 = smov 64   ;;  %s1502_s25 = smov 4  }
  0x13   :  { %34 = dma.hbm_to_vmem [thread:$0]  %s2155_s1, 1024, %s29_s13, [#allocation6], %s1501_s24, %s1501_s24, %s1502_s25  }
  0x14   :  { %s1427_s30 = scalar_lea.hbm %s2154_s0, 1024 }
  0x15   :  { %p1428_p8 = scmp.ne.s32.totalorder %s2154_s0, %s1427_s30  ;;  %p1431_p9 = scmp.lt.u32.totalorder %s1427_s30, %s2154_s0 }
  0x17   :  { %p1433_p10 = pnand %p1431_p9, %p1428_p8 }
  0x19   :  { %1436 = shalt.err (!%p1433_p10)
}
  0x1a   :  { %s1437_s8 = scalar_lea.vmem %s1527_s15, 1024  ;;  %p1442_p12 = scmp.lt.s32.totalorder %s1527_s15, %s1527_s15 }
  0x1b   :  { %p1438_p11 = scmp.ne.s32.totalorder %s1527_s15, %s1437_s8  ;;  %p1443_p13 = scmp.lt.s32.totalorder %s1437_s8, %s1437_s8 }
  0x1d   :  { %p1444_p0 = por %p1443_p13, %p1442_p12 }
  0x1f   :  { %p1445_p1 = pnand %p1444_p0, %p1438_p11 }
  0x21   :  { %1448 = shalt.err (!%p1445_p1)
}
  0x22   :  { %22 = dma.hbm_to_vmem [thread:$0]  %s2154_s0, 1024, %s1527_s15, [#allocation3], %s1501_s24, %s1501_s24, %s1502_s25  }
  0x23   :  { %s1503_s10 = smov [#allocation7]   ;;  %s1449_s14 = scalar_lea.hbm %s2156_s2, 2048 }
  0x24   :  { %s40_s11 = sshll.u32 %s1503_s10, 4  ;;  %p1450_p2 = scmp.ne.s32.totalorder %s2156_s2, %s1449_s14  ;;  %s41_s11 = int_to_ptr.vmem [resolvable:$true] %s40_s11 }
  0x25   :  { %p1453_p3 = scmp.lt.u32.totalorder %s1449_s14, %s2156_s2 }
  0x27   :  { %p1455_p4 = pnand %p1453_p3, %p1450_p2 }
  0x29   :  { %1458 = shalt.err (!%p1455_p4)
}
  0x2a   :  { %s1459_s20 = scalar_lea.vmem %s41_s11, 2048  ;;  %p1464_p6 = scmp.lt.s32.totalorder %s41_s11, %s41_s11 }
  0x2b   :  { %p1460_p5 = scmp.ne.s32.totalorder %s41_s11, %s1459_s20  ;;  %p1465_p7 = scmp.lt.s32.totalorder %s1459_s20, %s1459_s20 }
  0x2d   :  { %p1466_p8 = por %p1465_p7, %p1464_p6 }
  0x2f   :  { %p1467_p9 = pnand %p1466_p8, %p1460_p5 }
  0x31   :  { %1470 = shalt.err (!%p1467_p9)
}
  0x32   :  { %s1504_s0 = smov 128   ;;  %s1505_s15 = smov 8  }
  0x33   :  { %46 = dma.hbm_to_vmem [thread:$0]  %s2156_s2, 2048, %s41_s11, [#allocation6], %s1504_s0, %s1504_s0, %s1505_s15  }
  0x34   :  { %1493 = dma.done.wait [#allocation3], 1024  }
  0x35   :  { %1494 = vsyncadd [#allocation3], 4294966272 }
  0x36   :  { %1495 = dma.done.wait [#allocation6], 3072  }
  0x37   :  { %1496 = vsyncadd [#allocation6], 4294964224  ;;  %v1261_v0 = vld [vmem:[#allocation2] sm:$0xff]   ;;  %v1262_v1 = vld [vmem:[#allocation2 + $0x8] sm:$0xff]   ;;  %s1506_s2 = smov [#allocation8]  }
  0x38   :  { %1125 = vmatprep.subr.bf16.mxu0 %v1261_v0  ;;  %1157 = vmatprep.subr.bf16.mxu1 %v1261_v0  ;;  %v1263_v2 = vld [vmem:[#allocation2 + $0x10] sm:$0xff]   ;;  %v1264_v3 = vld [vmem:[#allocation2 + $0x18] sm:$0xff]   ;;  %v1570_v4 = vld [vmem:[#allocation7] sm:$0xff]  ;;  %s1027_s23 = sshll.u32 %s1506_s2, 4  ;;  %s1028_s23 = int_to_ptr.vmem [resolvable:$true] %s1027_s23 }
  0x39   :  { %1126 = vmatpush3.bf16.msra.mxu0 %v1261_v0  ;;  %1158 = vmatpush3.bf16.msra.mxu1 %v1261_v0  ;;  %v1572_v5 = vld [vmem:[#allocation7 + $0x8] sm:$0xff]  ;;  %v1574_v6 = vld [vmem:[#allocation7 + $0x10] sm:$0xff]  ;;  %vm258_vm0 = vcmp.gt.f32.partialorder %v1570_v4, 0.0  ;;  %v1582_v8 = vld [vmem:[#allocation7 + $0x18] sm:$0xff]  ;;  %s1471_s24 = scalar_lea.vmem %s1028_s23, 16  ;;  %s1475_s25 = scalar_lea.vmem %s1028_s23, 32 }
  0x3a   :  { %1127 = vmatprep.subr.bf16.mxu0 %v1262_v1  ;;  %1159 = vmatprep.subr.bf16.mxu1 %v1262_v1  ;;  %v1578_v7 = vpack.c.bf16 %v1572_v5, %v1570_v4  ;;  %vm259_vm1 = vcmp.gt.f32.partialorder %v1572_v5, 0.0  ;;  %vm260_vm2 = vcmp.gt.f32.partialorder %v1574_v6, 0.0  ;;  %v274_v9 = vsel %vm258_vm0, %v1570_v4, 1.0  ;;  %v1265_v13 = vld [vmem:[#allocation2 + $0x20] sm:$0xff]   ;;  %v1600_v15 = vld [vmem:[#allocation7 + $0x28] sm:$0xff]  ;;  %v1605_v16 = vld [vmem:[#allocation7 + $0x30] sm:$0xff]  ;;  %p1472_p10 = scmp.ne.s32.totalorder %s1028_s23, %s1471_s24  ;;  %p1476_p11 = scmp.lt.s32.totalorder %s1028_s23, %s1028_s23 }
  0x3b   :  { %v275_v10 = vsel %vm259_vm1, %v1572_v5, 1.0  ;;  %vm261_vm3 = vcmp.gt.f32.partialorder %v1582_v8, 0.0  ;;  %1277 = vlog2.f32 %v274_v9  ;;  %v276_v11 = vsel %vm260_vm2, %v1574_v6, 1.0  ;;  %v1598_v14 = vld [vmem:[#allocation7 + $0x20] sm:$0xff]  ;;  %v1607_v17 = vld [vmem:[#allocation7 + $0x38] sm:$0xff]  ;;  %v1266_v20 = vld [vmem:[#allocation2 + $0x28] sm:$0xff]   ;;  %p1477_p12 = scmp.lt.s32.totalorder %s1475_s25, %s1471_s24 }
  0x3c   :  { %v277_v12 = vsel %vm261_vm3, %v1582_v8, 1.0  ;;  %1279 = vlog2.f32 %v275_v10  ;;  %1141 = vmatprep.mubr.bf16.mxu0 %v1578_v7  ;;  %vm262_vm4 = vcmp.gt.f32.partialorder %v1598_v14, 0.0  ;;  %vm263_vm5 = vcmp.gt.f32.partialorder %v1600_v15, 0.0  ;;  %v1623_v23 = vld [vmem:[#allocation7 + $0x40] sm:$0xff]  ;;  %v1625_v24 = vld [vmem:[#allocation7 + $0x48] sm:$0xff]  ;;  %v1628_v25 = vld [vmem:[#allocation7 + $0x50] sm:$0xff] }
  0x3d   :  { %1128 = vmatpush3.bf16.msra.mxu0 %v1262_v1  ;;  %1160 = vmatpush3.bf16.msra.mxu1 %v1262_v1  ;;  %1281 = vlog2.f32 %v276_v11  ;;  %v278_v18 = vsel %vm262_vm4, %v1598_v14, 1.0  ;;  %v279_v19 = vsel %vm263_vm5, %v1600_v15, 1.0  ;;  %vm264_vm6 = vcmp.gt.f32.partialorder %v1605_v16, 0.0  ;;  %v1630_v26 = vld [vmem:[#allocation7 + $0x58] sm:$0xff]  ;;  %v1267_v29 = vld [vmem:[#allocation2 + $0x30] sm:$0xff]   ;;  %v1641_v30 = vld [vmem:[#allocation7 + $0x60] sm:$0xff]  ;;  %p1478_p13 = por %p1477_p12, %p1476_p11 }
  0x3e   :  { %1129 = vmatprep.subr.bf16.mxu0 %v1263_v2  ;;  %1161 = vmatprep.subr.bf16.mxu1 %v1263_v2  ;;  %1283 = vlog2.f32 %v277_v12  ;;  %vm265_vm7 = vcmp.gt.f32.partialorder %v1607_v17, 0.0  ;;  %v280_v21 = vsel %vm264_vm6, %v1605_v16, 1.0  ;;  %vm266_vm8 = vcmp.gt.f32.partialorder %v1623_v23, 0.0  ;;  %v1646_v33 = vld [vmem:[#allocation7 + $0x68] sm:$0xff]  ;;  %v1656_v40 = vld [vmem:[#allocation7 + $0x70] sm:$0xff]  ;;  %v1268_v42 = vld [vmem:[#allocation2 + $0x38] sm:$0xff]  }
  0x3f   :  { %1285 = vlog2.f32 %v278_v18  ;;  %v281_v22 = vsel %vm265_vm7, %v1607_v17, 1.0  ;;  %vm267_vm9 = vcmp.gt.f32.partialorder %v1625_v24, 0.0  ;;  %v282_v27 = vsel %vm266_vm8, %v1623_v23, 1.0  ;;  %v1659_v45 = vld [vmem:[#allocation7 + $0x78] sm:$0xff]  ;;  %vm1669_vm14 = vmpackc.low %vm259_vm1, %vm258_vm0  ;;  %v1269_v59 = vld [vmem:[#allocation5] sm:$0xff]   ;;  %p1479_p0 = pnand %p1478_p13, %p1472_p10 }
  0x40   :  { %1287 = vlog2.f32 %v279_v19  ;;  %v283_v28 = vsel %vm267_vm9, %v1625_v24, 1.0  ;;  %vm268_vm10 = vcmp.gt.f32.partialorder %v1628_v25, 0.0  ;;  %vm269_vm11 = vcmp.gt.f32.partialorder %v1630_v26, 0.0  ;;  %vm1048_vm0 = vmpackc.low %vm261_vm3, %vm260_vm2  ;;  %v1270_v11 = vld [vmem:[#allocation5 + $0x8] sm:$0xff]  }
  0x41   :  { %1130 = vmatpush3.bf16.msra.mxu0 %v1263_v2  ;;  %1162 = vmatpush3.bf16.msra.mxu1 %v1263_v2  ;;  %1289 = vlog2.f32 %v280_v21  ;;  %v284_v32 = vsel %vm268_vm10, %v1628_v25, 1.0  ;;  %vm270_vm12 = vcmp.gt.f32.partialorder %v1641_v30, 0.0  ;;  %v285_v36 = vsel %vm269_vm11, %v1630_v26, 1.0  ;;  %vm1051_vm1 = vmpackc.low %vm263_vm5, %vm262_vm4 }
  0x42   :  { %1131 = vmatprep.subr.bf16.mxu0 %v1264_v3  ;;  %1163 = vmatprep.subr.bf16.mxu1 %v1264_v3  ;;  %1291 = vlog2.f32 %v281_v22  ;;  %vm2158_vm13 = vcmp.gt.f32.partialorder %v1646_v33, 0.0  ;;  %v286_v39 = vsel %vm270_vm12, %v1641_v30, 1.0  ;;  %vm272_vm15 = vcmp.gt.f32.partialorder %v1656_v40, 0.0  ;;  %vm1054_vm2 = vmpackc.low %vm265_vm7, %vm264_vm6 }
  0x43   :  { %1293 = vlog2.f32 %v282_v27  ;;  %v287_v49 = vsel %vm2158_vm13, %v1646_v33, 1.0  ;;  %vm273_vm13 = vcmp.gt.f32.partialorder %v1659_v45, 0.0  ;;  %v1681_v61 = vpack.c.bf16 %v1582_v8, %v1574_v6  ;;  %vm1057_vm3 = vmpackc.low %vm267_vm9, %vm266_vm8 }
  0x44   :  { %1295 = vlog2.f32 %v283_v28  ;;  %v288_v0 = vsel %vm272_vm15, %v1656_v40, 1.0  ;;  %v289_v10 = vsel %vm273_vm13, %v1659_v45, 1.0  ;;  %v1697_v12 = vpack.c.bf16 %v1600_v15, %v1598_v14  ;;  %vm1060_vm4 = vmpackc.low %vm269_vm11, %vm268_vm10 }
  0x45   :  { %1132 = vmatpush3.bf16.msra.mxu0 %v1264_v3  ;;  %1164 = vmatpush3.bf16.msra.mxu1 %v1264_v3  ;;  %v1278_v31 = vpop.eup %1277  ;;  %1297 = vlog2.f32 %v284_v32  ;;  %vm2178_vm5 = vcmp.gt.f32.partialorder %v1646_v33, 0.0  ;;  %vm1066_vm7 = vmpackc.low %vm273_vm13, %vm272_vm15 }
  0x46   :  { %1133 = vmatprep.subr.bf16.mxu0 %v1265_v13  ;;  %1165 = vmatprep.subr.bf16.mxu1 %v1265_v13  ;;  %v1280_v34 = vpop.eup %1279  ;;  %v291_v35 = vmul.f32 0.6931472, %v1278_v31  ;;  %1299 = vlog2.f32 %v285_v36  ;;  %vm1063_vm6 = vmpackc.low %vm2178_vm5, %vm270_vm12 }
  0x47   :  { %v1282_v37 = vpop.eup %1281  ;;  %v293_v38 = vmul.f32 0.6931472, %v1280_v34  ;;  %1301 = vlog2.f32 %v286_v39  ;;  %v1272_v39 = vld [vmem:[#allocation5 + $0x18] sm:$0xff]  }
  0x48   :  { %v1284_v41 = vpop.eup %1283  ;;  %v322_v43 = vmul.f32 %v291_v35, %v1570_v4  ;;  %v295_v44 = vmul.f32 0.6931472, %v1282_v37  ;;  %1303 = vlog2.f32 %v287_v49  ;;  %v1711_v35 = vpack.c.bf16 %v1607_v17, %v1605_v16 }
  0x49   :  { %1134 = vmatpush3.bf16.msra.mxu0 %v1265_v13  ;;  %1166 = vmatpush3.bf16.msra.mxu1 %v1265_v13  ;;  %v1286_v46 = vpop.eup %1285  ;;  %v323_v47 = vmul.f32 %v293_v38, %v1572_v5  ;;  %v297_v48 = vmul.f32 0.6931472, %v1284_v41  ;;  %1305 = vlog2.f32 %v288_v0  ;;  %v77_v41 = vpack.c.bf16 %v1625_v24, %v1623_v23 }
  0x4a   :  { %1135 = vmatprep.subr.bf16.mxu0 %v1266_v20  ;;  %1167 = vmatprep.subr.bf16.mxu1 %v1266_v20  ;;  %v1288_v50 = vpop.eup %1287  ;;  %v324_v52 = vmul.f32 %v295_v44, %v1574_v6  ;;  %v299_v53 = vmul.f32 0.6931472, %v1286_v46  ;;  %1307 = vlog2.f32 %v289_v10  ;;  %v80_v0 = vpack.c.bf16 %v1659_v45, %v1656_v40 }
  0x4b   :  { %v1290_v54 = vpop.eup %1289  ;;  %v1046_v55 = vpack.c.bf16 %v323_v47, %v322_v43  ;;  %v325_v56 = vmul.f32 %v297_v48, %v1582_v8  ;;  %v301_v57 = vmul.f32 0.6931472, %v1288_v50  ;;  %v1273_v50 = vld [vmem:[#allocation5 + $0x20] sm:$0xff]  }
  0x4c   :  { %v1292_v58 = vpop.eup %1291  ;;  %v326_v62 = vmul.f32 %v299_v53, %v1598_v14  ;;  %v303_v3 = vmul.f32 0.6931472, %v1290_v54  ;;  %v78_v53 = vpack.c.bf16 %v1630_v26, %v1628_v25 }
  0x4d   :  { %1136 = vmatpush3.bf16.msra.mxu0 %v1266_v20  ;;  %1168 = vmatpush3.bf16.msra.mxu1 %v1266_v20  ;;  %v1294_v60 = vpop.eup %1293  ;;  %v327_v63 = vmul.f32 %v301_v57, %v1600_v15  ;;  %v1049_v2 = vpack.c.bf16 %v325_v56, %v324_v52  ;;  %v305_v9 = vmul.f32 0.6931472, %v1292_v58  ;;  %v1274_v57 = vld [vmem:[#allocation5 + $0x28] sm:$0xff]   ;;  %v79_v58 = vpack.c.bf16 %v1646_v33, %v1641_v30 }
  0x4e   :  { %1137 = vmatprep.subr.bf16.mxu0 %v1267_v29  ;;  %1169 = vmatprep.subr.bf16.mxu1 %v1267_v29  ;;  %v1296_v1 = vpop.eup %1295  ;;  %v307_v18 = vmul.f32 0.6931472, %v1294_v60  ;;  %v328_v21 = vmul.f32 %v303_v3, %v1605_v16 }
  0x4f   :  { %1173 = vmatprep.mubr.msk.bf16.mxu1 %vm1669_vm14, %v1046_v55  ;;  %v1052_v13 = vpack.c.bf16 %v327_v63, %v326_v62  ;;  %v309_v19 = vmul.f32 0.6931472, %v1296_v1  ;;  %v1298_v20 = vpop.eup %1297  ;;  %v329_v22 = vmul.f32 %v305_v9, %v1607_v17  ;;  %v1275_v63 = vld [vmem:[#allocation5 + $0x30] sm:$0xff]  }
  0x50   :  { %v1300_v27 = vpop.eup %1299  ;;  %v330_v31 = vmul.f32 %v307_v18, %v1623_v23  ;;  %v311_v37 = vmul.f32 0.6931472, %v1298_v20 }
  0x51   :  { %1138 = vmatpush3.bf16.msra.mxu0 %v1267_v29  ;;  %1170 = vmatpush3.bf16.msra.mxu1 %v1267_v29  ;;  %v1302_v28 = vpop.eup %1301  ;;  %v1271_v29 = vld [vmem:[#allocation5 + $0x10] sm:$0xff]   ;;  %v331_v32 = vmul.f32 %v309_v19, %v1625_v24  ;;  %v1055_v36 = vpack.c.bf16 %v329_v22, %v328_v21  ;;  %v313_v38 = vmul.f32 0.6931472, %v1300_v27 }
  0x52   :  { %1139 = vmatprep.subr.bf16.mxu0 %v1268_v42  ;;  %1171 = vmatprep.subr.bf16.mxu1 %v1268_v42  ;;  %v1304_v34 = vpop.eup %1303  ;;  %v315_v43 = vmul.f32 0.6931472, %v1302_v28  ;;  %v332_v47 = vmul.f32 %v311_v37, %v1628_v25 }
  0x53   :  { %v317_v44 = vmul.f32 0.6931472, %v1304_v34  ;;  %v1306_v46 = vpop.eup %1305  ;;  %v333_v48 = vmul.f32 %v313_v38, %v1630_v26 }
  0x54   :  { %v1308_v49 = vpop.eup %1307  ;;  %v334_v51 = vmul.f32 %v315_v43, %v1641_v30  ;;  %v319_v55 = vmul.f32 0.6931472, %v1306_v46 }
  0x55   :  { %1140 = vmatpush3.bf16.msra.mxu0 %v1268_v42  ;;  %1172 = vmatpush3.bf16.msra.mxu1 %v1268_v42  ;;  %v1058_v42 = vpack.c.bf16 %v331_v32, %v330_v31  ;;  %v335_v52 = vmul.f32 %v317_v44, %v1646_v33  ;;  %v1061_v54 = vpack.c.bf16 %v333_v48, %v332_v47  ;;  %v321_v56 = vmul.f32 0.6931472, %v1308_v49 }
  0x56   :  { %1189 = vmatprep.subr.bf16.mxu0 %v1269_v59  ;;  %1221 = vmatprep.subr.bf16.mxu1 %v1269_v59  ;;  %v336_v60 = vmul.f32 %v319_v55, %v1656_v40 }
  0x57   :  { %v337_v62 = vmul.f32 %v321_v56, %v1659_v45 }
  0x58   :  { %1142 = vmatmul.mubr.bf16.vlgmr.msra.gmra.mrb[0].mxu0 %v1681_v61  ;;  %1174 = vmatmul.mubr.msk.bf16.vlgmr.msra.gmra.mrb[0].mxu1 %vm1048_vm0, %v1049_v2  ;;  %v1276_v2 = vld [vmem:[#allocation5 + $0x38] sm:$0xff]  }
  0x59   :  { %1190 = vmatpush3.bf16.msra.mxu0 %v1269_v59  ;;  %1229 = vmatpush3.bf16.msra.mxu1 %v1269_v59  ;;  %v1064_v59 = vpack.c.bf16 %v335_v52, %v334_v51  ;;  %v1067_v1 = vpack.c.bf16 %v337_v62, %v336_v60 }
  0x5a   :  { %1191 = vmatprep.subr.bf16.mxu0 %v1270_v11  ;;  %1222 = vmatprep.subr.bf16.mxu1 %v1270_v11 }
  0x5b   :  { %1145 = vmatprep.mubr.bf16.mxu0 %v1697_v12  ;;  %1177 = vmatprep.mubr.msk.bf16.mxu1 %vm1051_vm1, %v1052_v13 }
  0x5d   :  { %1192 = vmatpush3.bf16.msra.mxu0 %v1270_v11  ;;  %1230 = vmatpush3.bf16.msra.mxu1 %v1270_v11 }
  0x5e   :  { %1193 = vmatprep.subr.bf16.mxu0 %v1271_v29  ;;  %1223 = vmatprep.subr.bf16.mxu1 %v1271_v29 }
  0x60   :  { %1146 = vmatmul.mubr.bf16.gmra.mrb[4].mxu0 %v1711_v35  ;;  %1178 = vmatmul.mubr.msk.bf16.gmra.mrb[4].mxu1 %vm1054_vm2, %v1055_v36 }
  0x61   :  { %1194 = vmatpush3.bf16.msra.mxu0 %v1271_v29  ;;  %1231 = vmatpush3.bf16.msra.mxu1 %v1271_v29 }
  0x62   :  { %1195 = vmatprep.subr.bf16.mxu0 %v1272_v39  ;;  %1224 = vmatprep.subr.bf16.mxu1 %v1272_v39 }
  0x63   :  { %1149 = vmatprep.mubr.bf16.mxu0 %v77_v41  ;;  %1181 = vmatprep.mubr.msk.bf16.mxu1 %vm1057_vm3, %v1058_v42 }
  0x65   :  { %1196 = vmatpush3.bf16.msra.mxu0 %v1272_v39  ;;  %1232 = vmatpush3.bf16.msra.mxu1 %v1272_v39 }
  0x66   :  { %1197 = vmatprep.subr.bf16.mxu0 %v1273_v50  ;;  %1225 = vmatprep.subr.bf16.mxu1 %v1273_v50 }
  0x68   :  { %1150 = vmatmul.mubr.bf16.gmra.mrb[8].mxu0 %v78_v53  ;;  %1182 = vmatmul.mubr.msk.bf16.gmra.mrb[8].mxu1 %vm1060_vm4, %v1061_v54 }
  0x69   :  { %1198 = vmatpush3.bf16.msra.mxu0 %v1273_v50  ;;  %1233 = vmatpush3.bf16.msra.mxu1 %v1273_v50 }
  0x6a   :  { %1199 = vmatprep.subr.bf16.mxu0 %v1274_v57  ;;  %1226 = vmatprep.subr.bf16.mxu1 %v1274_v57 }
  0x6b   :  { %1153 = vmatprep.mubr.bf16.mxu0 %v79_v58  ;;  %1185 = vmatprep.mubr.msk.bf16.mxu1 %vm1063_vm6, %v1064_v59 }
  0x6d   :  { %1200 = vmatpush3.bf16.msra.mxu0 %v1274_v57  ;;  %1234 = vmatpush3.bf16.msra.mxu1 %v1274_v57 }
  0x6e   :  { %1201 = vmatprep.subr.bf16.mxu0 %v1275_v63  ;;  %1227 = vmatprep.subr.bf16.mxu1 %v1275_v63 }
  0x70   :  { %1154 = vmatmul.mubr.bf16.gmra.mrb[12].mxu0 %v80_v0  ;;  %1186 = vmatmul.mubr.msk.bf16.gmra.mrb[12].mxu1 %vm1066_vm7, %v1067_v1 }
  0x71   :  { %1202 = vmatpush3.bf16.msra.mxu0 %v1275_v63  ;;  %1235 = vmatpush3.bf16.msra.mxu1 %v1275_v63 }
  0x72   :  { %1203 = vmatprep.subr.bf16.mxu0 %v1276_v2  ;;  %1228 = vmatprep.subr.bf16.mxu1 %v1276_v2 }
  0x73   :  { %1205 = vmatprep.mubr.bf16.mxu0 %v1578_v7  ;;  %1213 = vmatprep.mubr.bf16.mxu1 %v77_v41 }
  0x75   :  { %1204 = vmatpush3.bf16.msra.mxu0 %v1276_v2  ;;  %1236 = vmatpush3.bf16.msra.mxu1 %v1276_v2 }
  0x78   :  { %1206 = vmatmul.mubr.bf16.vlgmr.msra.gmra.mrb[16].mxu0 %v1681_v61  ;;  %1214 = vmatmul.mubr.bf16.vlgmr.msra.gmra.mrb[8].mxu1 %v78_v53 }
  0x79   :  { %1209 = vmatprep.mubr.bf16.mxu0 %v1697_v12  ;;  %1217 = vmatprep.mubr.bf16.mxu1 %v79_v58 }
  0x80   :  { %1210 = vmatmul.mubr.bf16.gmra.mrb[20].mxu0 %v1711_v35  ;;  %1218 = vmatmul.mubr.bf16.gmra.mrb[12].mxu1 %v80_v0 }
 0x12b   :  { %v1752_v3 = vpop.f32.mrb[0].mxu0  ;;  %v1754_v9 = vpop.f32.mrb[0].mxu1 }
 0x12c   :  { %v1756_v10 = vpop.f32.mrb[1].mxu0  ;;  %v1760_v7 = vmul.f32 %v1752_v3, %v1574_v6  ;;  %v1762_v11 = vpop.f32.mrb[1].mxu1  ;;  %vm461_vm8 = vcmp.gt.f32.partialorder %v1752_v3, 0.0  ;;  %1309 = vrcp.f32 %v1752_v3 }
 0x12d   :  { %v1766_v61 = vpop.f32.mrb[2].mxu0  ;;  %v1770_v12 = vmul.f32 %v1756_v10, %v1570_v4  ;;  %v1772_v13 = vpop.f32.mrb[2].mxu1  ;;  %vm459_vm9 = vcmp.gt.f32.partialorder %v1756_v10, 0.0  ;;  %1311 = vrcp.f32 %v1756_v10  ;;  %v493_v19 = vsel %vm461_vm8, %v1752_v3, 1.0 }
 0x12e   :  { %2179 = vst [vmem:[#allocation12_spill] sm:$0xff] %v1760_v7  ;;  %752 = vadd.xlane.f32.xlu1 %v1760_v7  ;;  %v1777_v6 = vpop.f32.mrb[3].mxu0  ;;  %v1779_v18 = vpop.f32.mrb[3].mxu1  ;;  %vm462_vm10 = vcmp.gt.f32.partialorder %v1766_v61, 0.0  ;;  %1313 = vrcp.f32 %v1766_v61  ;;  %v1794_v20 = vmul.f32 %v1766_v61, %v1582_v8  ;;  %v491_v21 = vsel %vm459_vm9, %v1756_v10, 1.0 }
 0x12f   :  { %2180 = vst [vmem:[#allocation13_spill] sm:$0xff] %v1770_v12  ;;  %748 = vadd.xlane.f32.xlu0 %v1770_v12  ;;  %v494_v4 = vsel %vm462_vm10, %v1766_v61, 1.0  ;;  %vm460_vm11 = vcmp.gt.f32.partialorder %v1777_v6, 0.0  ;;  %1315 = vrcp.f32 %v1777_v6  ;;  %v1801_v22 = vmul.f32 %v1777_v6, %v1572_v5 }
 0x130   :  { %2181 = vst [vmem:[#allocation14_spill] sm:$0xff] %v1794_v20  ;;  %1317 = vlog2.f32 %v493_v19  ;;  %v492_v27 = vsel %vm460_vm11, %v1777_v6, 1.0 }
 0x131   :  { %2182 = vst [vmem:[#allocation15_spill] sm:$0xff] %v1801_v22  ;;  %1319 = vlog2.f32 %v494_v4 }
 0x132   :  { %754 = vadd.xlane.f32.xlu1 %v1794_v20  ;;  %1321 = vlog2.f32 %v491_v21 }
 0x133   :  { %750 = vadd.xlane.f32.xlu0 %v1801_v22  ;;  %v1808_v8 = vpop.f32.mrb[4].mxu0  ;;  %v1810_v28 = vpop.f32.mrb[4].mxu1  ;;  %1323 = vlog2.f32 %v492_v27 }
 0x134   :  { %v1812_v29 = vpop.f32.mrb[5].mxu0  ;;  %v1816_v5 = vmul.f32 %v1808_v8, %v1605_v16  ;;  %v1818_v31 = vpop.f32.mrb[5].mxu1  ;;  %vm465_vm12 = vcmp.gt.f32.partialorder %v1808_v8, 0.0  ;;  %1325 = vrcp.f32 %v1808_v8 }
 0x135   :  { %v1822_v32 = vpop.f32.mrb[6].mxu0  ;;  %v1824_v34 = vpop.f32.mrb[6].mxu1  ;;  %vm463_vm13 = vcmp.gt.f32.partialorder %v1812_v29, 0.0  ;;  %1327 = vrcp.f32 %v1812_v29  ;;  %v497_v37 = vsel %vm465_vm12, %v1808_v8, 1.0  ;;  %v1859_v43 = vmul.f32 %v1812_v29, %v1598_v14 }
 0x136   :  { %2183 = vst [vmem:[#allocation16_spill] sm:$0xff] %v1816_v5  ;;  %v1828_v35 = vpop.f32.mrb[7].mxu0  ;;  %v1832_v16 = vmul.f32 %v1822_v32, %v1607_v17  ;;  %v1834_v36 = vpop.f32.mrb[7].mxu1  ;;  %vm466_vm14 = vcmp.gt.f32.partialorder %v1822_v32, 0.0  ;;  %1329 = vrcp.f32 %v1822_v32  ;;  %v495_v41 = vsel %vm463_vm13, %v1812_v29, 1.0 }
 0x137   :  { %2184 = vst [vmem:[#allocation17_spill] sm:$0xff] %v1828_v35  ;;  %v1840_v38 = vpop.eup %1309  ;;  %760 = vadd.xlane.f32.xlu0 %v1816_v5  ;;  %v498_v39 = vsel %vm466_vm14, %v1822_v32, 1.0  ;;  %vm464_vm15 = vcmp.gt.f32.partialorder %v1828_v35, 0.0  ;;  %1331 = vrcp.f32 %v1828_v35  ;;  %2186 = vst [vmem:[#allocation19_spill] sm:$0xff] %v1859_v43  ;;  %v1868_v47 = vmul.f32 %v1828_v35, %v1600_v15 }
 0x138   :  { %2185 = vst [vmem:[#allocation18_spill] sm:$0xff] %v1832_v16  ;;  %v1848_v17 = vpop.eup %1311  ;;  %762 = vadd.xlane.f32.xlu1 %v1832_v16  ;;  %1333 = vlog2.f32 %v497_v37  ;;  %v496_v44 = vsel %vm464_vm15, %v1828_v35, 1.0 }
 0x139   :  { %v1855_v42 = vpop.eup %1313  ;;  %2187 = vst [vmem:[#allocation20_spill] sm:$0xff] %v1868_v47  ;;  %1335 = vlog2.f32 %v498_v39 }
 0x13a   :  { %v1864_v46 = vpop.eup %1315  ;;  %1337 = vlog2.f32 %v495_v41 }
 0x13b   :  { %v1870_v48 = vpop.eup %1317  ;;  %756 = vadd.xlane.f32.xlu0 %v1859_v43  ;;  %v1873_v49 = vpop.f32.mrb[8].mxu0  ;;  %1339 = vlog2.f32 %v496_v44 }
 0x13c   :  { %v1875_v14 = vpop.eup %1319  ;;  %vm469_vm0 = vcmp.gt.f32.partialorder %v1873_v49, 0.0  ;;  %758 = vadd.xlane.f32.xlu1 %v1868_v47  ;;  %v1879_v50 = vpop.f32.mrb[9].mxu0  ;;  %v1883_v15 = vmul.f32 %v1873_v49, %v1628_v25  ;;  %1341 = vrcp.f32 %v1873_v49 }
 0x13d   :  { %v1322_v51 = vpop.eup %1321  ;;  %v501_v52 = vsel %vm469_vm0, %v1873_v49, 1.0  ;;  %vm467_vm1 = vcmp.gt.f32.partialorder %v1879_v50, 0.0  ;;  %v1890_v53 = vpop.f32.mrb[10].mxu0  ;;  %1343 = vrcp.f32 %v1879_v50  ;;  %v1920_v62 = vmul.f32 %v1879_v50, %v1623_v23 }
 0x13e   :  { %2188 = vst [vmem:[#allocation21_spill] sm:$0xff] %v1883_v15  ;;  %v1324_v54 = vpop.eup %1323  ;;  %v499_v25 = vsel %vm467_vm1, %v1879_v50, 1.0  ;;  %vm470_vm2 = vcmp.gt.f32.partialorder %v1890_v53, 0.0  ;;  %v1897_v55 = vpop.f32.mrb[11].mxu0  ;;  %v1901_v56 = vmul.f32 %v1890_v53, %v1630_v26  ;;  %1345 = vlog2.f32 %v501_v52 }
 0x13f   :  { %v1903_v57 = vpop.eup %1325  ;;  %v502_v58 = vsel %vm470_vm2, %v1890_v53, 1.0  ;;  %vm468_vm3 = vcmp.gt.f32.partialorder %v1897_v55, 0.0  ;;  %768 = vadd.xlane.f32.xlu0 %v1883_v15  ;;  %1347 = vlog2.f32 %v499_v25  ;;  %2190 = vst [vmem:[#allocation23_spill] sm:$0xff] %v1920_v62  ;;  %v1927_v0 = vmul.f32 %v1897_v55, %v1625_v24 }
 0x140   :  { %2189 = vst [vmem:[#allocation22_spill] sm:$0xff] %v1901_v56  ;;  %v1910_v59 = vpop.eup %1327  ;;  %v500_v60 = vsel %vm468_vm3, %v1897_v55, 1.0  ;;  %770 = vadd.xlane.f32.xlu1 %v1901_v56  ;;  %1349 = vlog2.f32 %v502_v58 }
 0x141   :  { %v1916_v26 = vpop.eup %1329  ;;  %1351 = vrcp.f32 %v1890_v53  ;;  %2191 = vst [vmem:[#allocation24_spill] sm:$0xff] %v1927_v0 }
 0x142   :  { %v1922_v63 = vpop.eup %1331  ;;  %1353 = vlog2.f32 %v500_v60  ;;  %v512_v60 = vmul.f32 0.6931472, %v1870_v48 }
 0x143   :  { %v1334_v1 = vpop.eup %1333  ;;  %764 = vadd.xlane.f32.xlu0 %v1920_v62  ;;  %v1930_v2 = vpop.f32.mrb[12].mxu0  ;;  %1355 = vrcp.f32 %v1897_v55  ;;  %v1977_v62 = vmul.f32 0.6931472, %v1324_v54 }
 0x144   :  { %v1336_v19 = vpop.eup %1335  ;;  %vm473_vm4 = vcmp.gt.f32.partialorder %v1930_v2, 0.0  ;;  %766 = vadd.xlane.f32.xlu1 %v1927_v0  ;;  %v1935_v23 = vpop.f32.mrb[13].mxu0  ;;  %1357 = vrcp.f32 %v1930_v2  ;;  %v1979_v56 = vmul.f32 0.6931472, %v1334_v1 }
 0x145   :  { %v1338_v4 = vpop.eup %1337  ;;  %v505_v24 = vsel %vm473_vm4, %v1930_v2, 1.0  ;;  %vm471_vm5 = vcmp.gt.f32.partialorder %v1935_v23, 0.0  ;;  %v1942_v21 = vpop.f32.mrb[14].mxu0  ;;  %v1946_v27 = vmul.f32 %v1935_v23, %v1641_v30  ;;  %v1981_v48 = vmul.f32 0.6931472, %v1336_v19 }
 0x146   :  { %v1340_v37 = vpop.eup %1339  ;;  %1359 = vlog2.f32 %v505_v24  ;;  %v503_v39 = vsel %vm471_vm5, %v1935_v23, 1.0  ;;  %vm474_vm6 = vcmp.gt.f32.partialorder %v1942_v21, 0.0  ;;  %v1952_v41 = vpop.f32.mrb[15].mxu0 }
 0x147   :  { %2192 = vst [vmem:[#allocation25_spill] sm:$0xff] %v1946_v27  ;;  %v1342_v44 = vpop.eup %1341  ;;  %1361 = vlog2.f32 %v503_v39  ;;  %v506_v52 = vsel %vm474_vm6, %v1942_v21, 1.0  ;;  %vm472_vm7 = vcmp.gt.f32.partialorder %v1952_v41, 0.0  ;;  %772 = vadd.xlane.f32.xlu0 %v1946_v27  ;;  %v1961_v30 = vmul.f32 %v1952_v41, %v1646_v33 }
 0x148   :  { %v1344_v25 = vpop.eup %1343  ;;  %1363 = vrcp.f32 %v1935_v23  ;;  %v504_v58 = vsel %vm472_vm7, %v1952_v41, 1.0  ;;  %v1971_v39 = vmul.f32 %v1930_v2, %v1656_v40  ;;  %v1974_v33 = vmul.f32 0.6931472, %v1875_v14 }
 0x149   :  { %2193 = vst [vmem:[#allocation26_spill] sm:$0xff] %v1961_v30  ;;  %v1346_v24 = vpop.eup %1345  ;;  %1365 = vlog2.f32 %v506_v52  ;;  %774 = vadd.xlane.f32.xlu1 %v1961_v30  ;;  %v508_v27 = vmul.f32 0.6931472, %v1322_v51  ;;  %v1986_v14 = vmul.f32 %v1942_v21, %v1659_v45  ;;  %v1988_v51 = vmul.f32 0.6931472, %v1338_v4 }
 0x14a   :  { %2194 = vst [vmem:[#allocation27_spill] sm:$0xff] %v1971_v39  ;;  %v1348_v0 = vpop.eup %1347  ;;  %1367 = vrcp.f32 %v1942_v21  ;;  %v1990_v15 = vmul.f32 0.6931472, %v1340_v37  ;;  %v528_v1 = vmul.f32 0.6931472, %v1346_v24 }
 0x14b   :  { %v1350_v52 = vpop.eup %1349  ;;  %1369 = vlog2.f32 %v504_v58  ;;  %v1215_v30 = vpop.f32.mrb[8].mxu1  ;;  %776 = vadd.xlane.f32.xlu0 %v1971_v39  ;;  %2195 = vst [vmem:[#allocation28_spill] sm:$0xff] %v1986_v14  ;;  %v524_v5 = vmul.f32 0.6931472, %v1348_v0 }
 0x14c   :  { %v1207_v40 = vpop.f32.mrb[16].mxu0  ;;  %v1352_v54 = vpop.eup %1351  ;;  %1371 = vrcp.f32 %v1952_v41  ;;  %v694_v19 = vmul.f32 %v1342_v44, %v1215_v30  ;;  %v530_v45 = vmul.f32 0.6931472, %v1350_v52 }
 0x14d   :  { %v630_v47 = vadd.f32 %v1207_v40, %v1754_v9  ;;  %v621_v58 = vpop.f32.mrb[17].mxu0  ;;  %v653_v43 = vpop.f32.mrb[9].mxu1  ;;  %778 = vadd.xlane.f32.xlu1 %v1986_v14 }
 0x14e   :  { %v1354_v16 = vpop.eup %1353  ;;  %v622_v39 = vadd.f32 %v621_v58, %v1762_v11  ;;  %v692_v22 = vmul.f32 %v1344_v25, %v653_v43  ;;  %v1216_v20 = vpop.f32.mrb[10].mxu1  ;;  %v710_v12 = vsub.f32 %v528_v1, %v694_v19 }
 0x14f   :  { %v1208_v4 = vpop.f32.mrb[18].mxu0  ;;  %v1356_v37 = vpop.eup %1355  ;;  %v686_v7 = vmul.f32 %v1840_v38, %v630_v47  ;;  %v695_v24 = vmul.f32 %v1352_v54, %v1216_v20  ;;  %v526_v0 = vmul.f32 0.6931472, %v1354_v16 }
 0x150   :  { %v633_v44 = vadd.f32 %v1208_v4, %v1772_v13  ;;  %v624_v9 = vpop.f32.mrb[19].mxu0  ;;  %v656_v30 = vpop.f32.mrb[11].mxu1  ;;  %v684_v35 = vmul.f32 %v1848_v17, %v622_v39  ;;  %v708_v11 = vsub.f32 %v524_v5, %v692_v22  ;;  %v2004_v47 = vsel %vm469_vm0, %v710_v12, 0.0 }
 0x151   :  { %v1358_v40 = vpop.eup %1357  ;;  %v625_v43 = vadd.f32 %v624_v9, %v1779_v18  ;;  %v711_v52 = vsub.f32 %v530_v45, %v695_v24  ;;  %v693_v14 = vmul.f32 %v1356_v37, %v656_v30  ;;  %v702_v1 = vsub.f32 %v512_v60, %v686_v7 }
 0x152   :  { %v1360_v25 = vpop.eup %1359  ;;  %v687_v58 = vmul.f32 %v1855_v42, %v633_v44  ;;  %v700_v13 = vsub.f32 %v508_v27, %v684_v35  ;;  %v2022_v3 = vsel %vm467_vm1, %v708_v11, 0.0  ;;  %vm975_vm0 = vcmask 654912  }
 0x153   :  { %v1362_v19 = vpop.eup %1361  ;;  %v685_v20 = vmul.f32 %v1864_v46, %v625_v43  ;;  %v536_v38 = vmul.f32 0.6931472, %v1360_v25  ;;  %v709_v22 = vsub.f32 %v526_v0, %v693_v14  ;;  %v2008_v18 = vsel %vm461_vm8, %v702_v1, 0.0  ;;  %v1211_v7 = vpop.f32.mrb[20].mxu0 }
 0x154   :  { %v1364_v17 = vpop.eup %1363  ;;  %v532_v5 = vmul.f32 0.6931472, %v1362_v19  ;;  %v703_v16 = vsub.f32 %v1974_v33, %v687_v58  ;;  %v1219_v60 = vpop.f32.mrb[12].mxu1  ;;  %v2013_v46 = vsel %vm459_vm9, %v700_v13, 0.0  ;;  %v2018_v12 = vsel %vm470_vm2, %v711_v52, 0.0 }
 0x155   :  { %v1366_v42 = vpop.eup %1365  ;;  %v701_v35 = vsub.f32 %v1977_v62, %v685_v20  ;;  %v646_v27 = vadd.f32 %v1211_v7, %v1810_v28  ;;  %v698_v39 = vmul.f32 %v1358_v40, %v1219_v60  ;;  %v637_v33 = vpop.f32.mrb[21].mxu0  ;;  %v2036_v28 = vsel %vm468_vm3, %v709_v22, 0.0  ;;  %v2198_v7 = vld [vmem:[#allocation13_spill] sm:$0xff] }
 0x156   :  { %v1368_v49 = vpop.eup %1367  ;;  %v669_v14 = vpop.f32.mrb[13].mxu1  ;;  %v538_v54 = vmul.f32 0.6931472, %v1366_v42  ;;  %v2027_v10 = vsel %vm462_vm10, %v703_v16, 0.0  ;;  %v638_v53 = vadd.f32 %v637_v33, %v1818_v31  ;;  %vm919_vm8 = vcmask 130112  }
 0x157   :  { %v1370_v62 = vpop.eup %1369  ;;  %v696_v45 = vmul.f32 %v1364_v17, %v669_v14  ;;  %v1212_v4 = vpop.f32.mrb[22].mxu0  ;;  %v2032_v50 = vsel %vm460_vm11, %v701_v35, 0.0  ;;  %v690_v44 = vmul.f32 %v1903_v57, %v646_v27  ;;  %v714_v61 = vsub.f32 %v536_v38, %v698_v39  ;;  %v2197_v17 = vld [vmem:[#allocation12_spill] sm:$0xff]  ;;  %v2199_v27 = vld [vmem:[#allocation14_spill] sm:$0xff] }
 0x158   :  { %v1220_v37 = vpop.f32.mrb[14].mxu1  ;;  %v1372_v24 = vpop.eup %1371  ;;  %v649_v9 = vadd.f32 %v1212_v4, %v1824_v34  ;;  %v688_v11 = vmul.f32 %v1910_v59, %v638_v53  ;;  %v534_v0 = vmul.f32 0.6931472, %v1370_v62  ;;  %v2200_v53 = vld [vmem:[#allocation15_spill] sm:$0xff]  ;;  %vm926_vm9 = vcmask 195712  }
 0x159   :  { %v699_v30 = vmul.f32 %v1368_v49, %v1220_v37  ;;  %v640_v40 = vpop.f32.mrb[23].mxu0  ;;  %v672_v31 = vpop.f32.mrb[15].mxu1  ;;  %v712_v43 = vsub.f32 %v532_v5, %v696_v45  ;;  %v706_v58 = vsub.f32 %v1979_v56, %v690_v44  ;;  %v2052_v59 = vsel %vm473_vm4, %v714_v61, 0.0 }
 0x15a   :  { %v641_v6 = vadd.f32 %v640_v40, %v1834_v36  ;;  %v691_v25 = vmul.f32 %v1916_v26, %v649_v9  ;;  %v697_v52 = vmul.f32 %v1372_v24, %v672_v31  ;;  %v704_v1 = vsub.f32 %v1988_v51, %v688_v11  ;;  %v2201_v24 = vld [vmem:[#allocation16_spill] sm:$0xff] }
 0x15b   :  { %v715_v55 = vsub.f32 %v538_v54, %v699_v30  ;;  %v2048_v34 = vsel %vm471_vm5, %v712_v43, 0.0  ;;  %v722_v26 = vsel %vm465_vm12, %v706_v58, 0.0  ;;  %v2202_v30 = vld [vmem:[#allocation18_spill] sm:$0xff]  ;;  %v2203_v43 = vld [vmem:[#allocation19_spill] sm:$0xff]  ;;  %vm933_vm10 = vcmask 261312  }
 0x15c   :  { %v689_v57 = vmul.f32 %v1922_v63, %v641_v6  ;;  %v713_v36 = vsub.f32 %v534_v0, %v697_v52  ;;  %v707_v19 = vsub.f32 %v1981_v48, %v691_v25  ;;  %v720_v63 = vsel %vm463_vm13, %v704_v1, 0.0  ;;  %v2204_v25 = vld [vmem:[#allocation20_spill] sm:$0xff] }
 0x15d   :  { %v2059_v56 = vsel %vm474_vm6, %v715_v55, 0.0  ;;  %vm940_vm11 = vcmask 326912   ;;  %vm947_vm12 = vcmask 392512   ;;  %vm954_vm13 = vcmask 458112  }
 0x15e   :  { %v705_v23 = vsub.f32 %v1990_v15, %v689_v57  ;;  %v723_v2 = vsel %vm466_vm14, %v707_v19, 0.0  ;;  %v2068_v51 = vsel %vm472_vm7, %v713_v36, 0.0  ;;  %v2205_v36 = vld [vmem:[#allocation21_spill] sm:$0xff]  ;;  %vm961_vm14 = vcmask 523712  }
 0x15f   :  { %vm982_vm1 = vcmask 720512   ;;  %vm989_vm2 = vcmask 786112   ;;  %vm996_vm3 = vcmask 851712   ;;  %vm1003_vm4 = vcmask 917312  }
 0x160   :  { %v2072_v20 = vsel %vm464_vm15, %v705_v23, 0.0  ;;  %v2206_v23 = vld [vmem:[#allocation22_spill] sm:$0xff]  ;;  %vm968_vm15 = vcmask 589312   ;;  %vm1010_vm5 = vcmask 982912   ;;  %vm1017_vm6 = vcmask 1048512  }
 0x1bb   :  { %v753_v48 = vpop.xlane.xlu1 %752 }
 0x1bc   :  { %1373 = vrcp.f32 %v753_v48  ;;  %v749_v21 = vpop.xlane.xlu0 %748 }
 0x1bd   :  { %1375 = vrcp.f32 %v749_v21 }
 0x1bf   :  { %v755_v38 = vpop.xlane.xlu1 %754 }
 0x1c0   :  { %1377 = vrcp.f32 %v755_v38  ;;  %v751_v29 = vpop.xlane.xlu0 %750  ;;  %v2207_v38 = vld [vmem:[#allocation23_spill] sm:$0xff] }
 0x1c1   :  { %1379 = vrcp.f32 %v751_v29 }
 0x1c4   :  { %v761_v15 = vpop.xlane.xlu0 %760 }
 0x1c5   :  { %1381 = vrcp.f32 %v761_v15  ;;  %v763_v32 = vpop.xlane.xlu1 %762 }
 0x1c6   :  { %v1374_v13 = vpop.eup %1373  ;;  %1383 = vrcp.f32 %v763_v32  ;;  %v2208_v32 = vld [vmem:[#allocation24_spill] sm:$0xff] }
 0x1c7   :  { %v1376_v41 = vpop.eup %1375  ;;  %v814_v22 = vmul.f32 %v1374_v13, %v2197_v17 }
 0x1c8   :  { %v757_v5 = vpop.xlane.xlu0 %756  ;;  %v812_v60 = vmul.f32 %v1376_v41, %v2198_v7 }
 0x1c9   :  { %1385 = vrcp.f32 %v757_v5  ;;  %v759_v16 = vpop.xlane.xlu1 %758  ;;  %v830_v42 = vmul.f32 %v814_v22, %v2008_v18 }
 0x1ca   :  { %v1378_v35 = vpop.eup %1377  ;;  %1387 = vrcp.f32 %v759_v16  ;;  %v828_v62 = vmul.f32 %v812_v60, %v2013_v46 }
 0x1cb   :  { %v1380_v49 = vpop.eup %1379  ;;  %848 = vadd.xlane.f32.xlu0 %v830_v42  ;;  %v815_v39 = vmul.f32 %v1378_v35, %v2199_v27  ;;  %v2210_v42 = vld [vmem:[#allocation26_spill] sm:$0xff]  ;;  %v2211_v35 = vld [vmem:[#allocation27_spill] sm:$0xff] }
 0x1cc   :  { %v769_v33 = vpop.xlane.xlu0 %768  ;;  %v813_v45 = vmul.f32 %v1380_v49, %v2200_v53 }
 0x1cd   :  { %1389 = vrcp.f32 %v769_v33  ;;  %v771_v14 = vpop.xlane.xlu1 %770  ;;  %v831_v54 = vmul.f32 %v815_v39, %v2027_v10  ;;  %v2212_v39 = vld [vmem:[#allocation28_spill] sm:$0xff] }
 0x1ce   :  { %1391 = vrcp.f32 %v771_v14  ;;  %v829_v9 = vmul.f32 %v813_v45, %v2032_v50 }
 0x1cf   :  { %v1382_v4 = vpop.eup %1381  ;;  %850 = vadd.xlane.f32.xlu1 %v831_v54  ;;  %844 = vadd.xlane.f32.xlu0 %v828_v62 }
 0x1d0   :  { %v1384_v18 = vpop.eup %1383  ;;  %v765_v37 = vpop.xlane.xlu0 %764  ;;  %v818_v44 = vmul.f32 %v1382_v4, %v2201_v24 }
 0x1d1   :  { %1393 = vrcp.f32 %v765_v37  ;;  %v767_v61 = vpop.xlane.xlu1 %766  ;;  %v819_v40 = vmul.f32 %v1384_v18, %v2202_v30 }
 0x1d2   :  { %1395 = vrcp.f32 %v767_v61  ;;  %v834_v10 = vmul.f32 %v818_v44, %v722_v26 }
 0x1d3   :  { %v1386_v31 = vpop.eup %1385  ;;  %846 = vadd.xlane.f32.xlu1 %v829_v9  ;;  %v835_v0 = vmul.f32 %v819_v40, %v723_v2 }
 0x1d4   :  { %v1388_v46 = vpop.eup %1387  ;;  %v773_v11 = vpop.xlane.xlu0 %772  ;;  %856 = vadd.xlane.f32.xlu0 %v834_v10  ;;  %v816_v6 = vmul.f32 %v1386_v31, %v2203_v43 }
 0x1d5   :  { %1397 = vrcp.f32 %v773_v11  ;;  %v817_v55 = vmul.f32 %v1388_v46, %v2204_v25 }
 0x1d6   :  { %v775_v52 = vpop.xlane.xlu1 %774  ;;  %v832_v58 = vmul.f32 %v816_v6, %v720_v63 }
 0x1d7   :  { %v1390_v57 = vpop.eup %1389  ;;  %1399 = vrcp.f32 %v775_v52  ;;  %858 = vadd.xlane.f32.xlu1 %v835_v0  ;;  %v833_v19 = vmul.f32 %v817_v55, %v2072_v20  ;;  %v2209_v20 = vld [vmem:[#allocation25_spill] sm:$0xff] }
 0x1d8   :  { %v1392_v50 = vpop.eup %1391  ;;  %v777_v1 = vpop.xlane.xlu0 %776  ;;  %852 = vadd.xlane.f32.xlu0 %v832_v58  ;;  %v822_v26 = vmul.f32 %v1390_v57, %v2205_v36 }
 0x1d9   :  { %1401 = vrcp.f32 %v777_v1  ;;  %v823_v8 = vmul.f32 %v1392_v50, %v2206_v23 }
 0x1da   :  { %v779_v48 = vpop.xlane.xlu1 %778  ;;  %v838_v2 = vmul.f32 %v822_v26, %v2004_v47 }
 0x1db   :  { %v1394_v21 = vpop.eup %1393  ;;  %1403 = vrcp.f32 %v779_v48  ;;  %854 = vadd.xlane.f32.xlu1 %v833_v19  ;;  %v839_v15 = vmul.f32 %v823_v8, %v2018_v12 }
 0x1dc   :  { %v1396_v63 = vpop.eup %1395  ;;  %864 = vadd.xlane.f32.xlu0 %v838_v2  ;;  %v820_v29 = vmul.f32 %v1394_v21, %v2207_v38 }
 0x1dd   :  { %v821_v13 = vmul.f32 %v1396_v63, %v2208_v32 }
 0x1de   :  { %v836_v41 = vmul.f32 %v820_v29, %v2022_v3 }
 0x1df   :  { %v1398_v17 = vpop.eup %1397  ;;  %866 = vadd.xlane.f32.xlu1 %v839_v15  ;;  %v837_v47 = vmul.f32 %v821_v13, %v2036_v28 }
 0x1e0   :  { %860 = vadd.xlane.f32.xlu0 %v836_v41  ;;  %v824_v22 = vmul.f32 %v1398_v17, %v2209_v20 }
 0x1e1   :  { %v1400_v5 = vpop.eup %1399 }
 0x1e2   :  { %v840_v16 = vmul.f32 %v824_v22, %v2048_v34  ;;  %v825_v7 = vmul.f32 %v1400_v5, %v2210_v42  ;;  %v908_v34 = vlaneseq }
 0x1e3   :  { %v1402_v60 = vpop.eup %1401  ;;  %862 = vadd.xlane.f32.xlu1 %v837_v47 }
 0x1e4   :  { %868 = vadd.xlane.f32.xlu0 %v840_v16  ;;  %v841_v12 = vmul.f32 %v825_v7, %v2068_v51  ;;  %v826_v49 = vmul.f32 %v1402_v60, %v2211_v35  ;;  %v2103_v54 = vand.u32 127, %v908_v34  ;;  %v2106_v45 = vshrl.u32 %v908_v34, 7 }
 0x1e5   :  { %v1404_v3 = vpop.eup %1403 }
 0x1e6   :  { %v842_v27 = vmul.f32 %v826_v49, %v2052_v59  ;;  %v827_v33 = vmul.f32 %v1404_v3, %v2212_v39  ;;  %v914_v62 = vadd.s32 4294967288, %v2103_v54  ;;  %v921_v4 = vadd.s32 4294967280, %v2103_v54 }
 0x1e7   :  { %870 = vadd.xlane.f32.xlu1 %v841_v12  ;;  %v912_v59 = vsub.s32 %v2103_v54, %v2106_v45  ;;  %v935_v24 = vadd.s32 4294967264, %v2103_v54  ;;  %v928_v44 = vadd.s32 4294967272, %v2103_v54  ;;  %v942_v46 = vadd.s32 4294967256, %v2103_v54 }
 0x1e8   :  { %872 = vadd.xlane.f32.xlu0 %v842_v27  ;;  %v843_v28 = vmul.f32 %v827_v33, %v2059_v56  ;;  %v917_v37 = vsub.s32 %v914_v62, %v2106_v45  ;;  %v924_v30 = vsub.s32 %v921_v4, %v2106_v45  ;;  %v949_v58 = vadd.s32 4294967248, %v2103_v54 }
 0x1e9   :  { %v938_v43 = vsub.s32 %v935_v24, %v2106_v45  ;;  %v931_v6 = vsub.s32 %v928_v44, %v2106_v45  ;;  %v956_v50 = vadd.s32 4294967240, %v2103_v54  ;;  %v945_v1 = vsub.s32 %v942_v46, %v2106_v45 }
 0x1ea   :  { %v963_v23 = vadd.s32 4294967232, %v2103_v54  ;;  %v952_v21 = vsub.s32 %v949_v58, %v2106_v45  ;;  %v977_v15 = vadd.s32 4294967216, %v2103_v54  ;;  %v970_v32 = vadd.s32 4294967224, %v2103_v54 }
 0x1eb   :  { %874 = vadd.xlane.f32.xlu1 %v843_v28  ;;  %v959_v13 = vsub.s32 %v956_v50, %v2106_v45  ;;  %v984_v47 = vadd.s32 4294967208, %v2103_v54  ;;  %v991_v60 = vadd.s32 4294967200, %v2103_v54  ;;  %v998_v49 = vadd.s32 4294967192, %v2103_v54 }
 0x1ec   :  { %v966_v20 = vsub.s32 %v963_v23, %v2106_v45  ;;  %v980_v12 = vsub.s32 %v977_v15, %v2106_v45  ;;  %v973_v35 = vsub.s32 %v970_v32, %v2106_v45  ;;  %v1005_v28 = vadd.s32 4294967184, %v2103_v54 }
 0x1ed   :  { %v994_v4 = vsub.s32 %v991_v60, %v2106_v45  ;;  %v1012_v24 = vadd.s32 4294967176, %v2103_v54 }
 0x1ef   :  { %v1015_v54 = vsub.s32 %v1012_v24, %v2106_v45 }
 0x258   :  { %v849_v14 = vpop.xlane.xlu0 %848 }
 0x259   :  { %v878_v40 = vmul.f32 0.36067376, %v849_v14  ;;  %v987_v14 = vsub.s32 %v984_v47, %v2106_v45 }
 0x25b   :  { %v925_v52 = vrot.slane %v878_v40, %v924_v30  ;;  %v1008_v30 = vsub.s32 %v1005_v28, %v2106_v45 }
 0x25c   :  { %v851_v53 = vpop.xlane.xlu1 %850  ;;  %v845_v51 = vpop.xlane.xlu0 %844 }
 0x25d   :  { %v876_v18 = vmul.f32 0.36067376, %v845_v51  ;;  %v879_v0 = vmul.f32 0.36067376, %v851_v53 }
 0x25f   :  { %v913_v10 = vrot.slane %v876_v18, %v912_v59  ;;  %v932_v8 = vrot.slane %v879_v0, %v931_v6 }
 0x260   :  { %v847_v56 = vpop.xlane.xlu1 %846 }
 0x261   :  { %v877_v61 = vmul.f32 0.36067376, %v847_v56  ;;  %v857_v9 = vpop.xlane.xlu0 %856  ;;  %v1001_v56 = vsub.s32 %v998_v49, %v2106_v45 }
 0x262   :  { %v882_v63 = vmul.f32 0.36067376, %v857_v9 }
 0x263   :  { %v918_v31 = vrot.slane %v877_v61, %v917_v37 }
 0x264   :  { %v859_v11 = vpop.xlane.xlu1 %858  ;;  %v953_v42 = vrot.slane %v882_v63, %v952_v21 }
 0x265   :  { %v920_v25 = vsel %vm919_vm8, %v918_v31, %v913_v10  ;;  %v853_v55 = vpop.xlane.xlu0 %852  ;;  %v883_v22 = vmul.f32 0.36067376, %v859_v11 }
 0x266   :  { %v880_v57 = vmul.f32 0.36067376, %v853_v55  ;;  %v927_v36 = vsel %vm926_vm9, %v925_v52, %v920_v25 }
 0x267   :  { %v934_v38 = vsel %vm933_vm10, %v932_v8, %v927_v36  ;;  %v960_v34 = vrot.slane %v883_v22, %v959_v13 }
 0x268   :  { %v939_v26 = vrot.slane %v880_v57, %v938_v43  ;;  %v855_v19 = vpop.xlane.xlu1 %854 }
 0x269   :  { %v881_v48 = vmul.f32 0.36067376, %v855_v19  ;;  %v865_v2 = vpop.xlane.xlu0 %864 }
 0x26a   :  { %v941_v41 = vsel %vm940_vm11, %v939_v26, %v934_v38  ;;  %v886_v27 = vmul.f32 0.36067376, %v865_v2 }
 0x26b   :  { %v946_v29 = vrot.slane %v881_v48, %v945_v1 }
 0x26c   :  { %v867_v17 = vpop.xlane.xlu1 %866  ;;  %v981_v44 = vrot.slane %v886_v27, %v980_v12 }
 0x26d   :  { %v948_v5 = vsel %vm947_vm12, %v946_v29, %v941_v41  ;;  %v861_v16 = vpop.xlane.xlu0 %860  ;;  %v887_v62 = vmul.f32 0.36067376, %v867_v17 }
 0x26e   :  { %v884_v7 = vmul.f32 0.36067376, %v861_v16  ;;  %v955_v3 = vsel %vm954_vm13, %v953_v42, %v948_v5 }
 0x26f   :  { %v962_v18 = vsel %vm961_vm14, %v960_v34, %v955_v3  ;;  %v988_v40 = vrot.slane %v887_v62, %v987_v14 }
 0x270   :  { %v967_v39 = vrot.slane %v884_v7, %v966_v20  ;;  %v863_v33 = vpop.xlane.xlu1 %862 }
 0x271   :  { %v885_v53 = vmul.f32 0.36067376, %v863_v33  ;;  %v869_v51 = vpop.xlane.xlu0 %868 }
 0x272   :  { %v888_v59 = vmul.f32 0.36067376, %v869_v51  ;;  %v969_v61 = vsel %vm968_vm15, %v967_v39, %v962_v18 }
 0x273   :  { %v974_v37 = vrot.slane %v885_v53, %v973_v35 }
 0x274   :  { %v871_v9 = vpop.xlane.xlu1 %870  ;;  %v995_v43 = vrot.slane %v888_v59, %v994_v4 }
 0x275   :  { %v976_v10 = vsel %vm975_vm0, %v974_v37, %v969_v61  ;;  %v889_v31 = vmul.f32 0.36067376, %v871_v9  ;;  %v873_v46 = vpop.xlane.xlu0 %872 }
 0x276   :  { %v983_v11 = vsel %vm982_vm1, %v981_v44, %v976_v10  ;;  %v890_v6 = vmul.f32 0.36067376, %v873_v46 }
 0x277   :  { %v990_v0 = vsel %vm989_vm2, %v988_v40, %v983_v11  ;;  %v1002_v25 = vrot.slane %v889_v31, %v1001_v56 }
 0x278   :  { %v997_v55 = vsel %vm996_vm3, %v995_v43, %v990_v0  ;;  %v1009_v52 = vrot.slane %v890_v6, %v1008_v30  ;;  %v875_v58 = vpop.xlane.xlu1 %874 }
 0x279   :  { %v1004_v57 = vsel %vm1003_vm4, %v1002_v25, %v997_v55  ;;  %v891_v50 = vmul.f32 0.36067376, %v875_v58 }
 0x27a   :  { %v1011_v36 = vsel %vm1010_vm5, %v1009_v52, %v1004_v57 }
 0x27b   :  { %v1016_v1 = vrot.slane %v891_v50, %v1015_v54 }
 0x27d   :  { %v1018_v26 = vsel %vm1017_vm6, %v1016_v1, %v1011_v36 }
 0x27e   :  { %1020 = vst [vmem:[#allocation8] sm:$0x1] %v1018_v26 }
 0x27f   :  { %1482 = shalt.err (!%p1479_p0)
}
 0x280   :  { %s1483_s28 = scalar_lea.hbm %s2157_s3, 16 }
 0x281   :  { %p1484_p1 = scmp.ne.s32.totalorder %s2157_s3, %s1483_s28  ;;  %p1487_p2 = scmp.lt.u32.totalorder %s1483_s28, %s2157_s3 }
 0x283   :  { %p1489_p3 = pnand %p1487_p2, %p1484_p1 }
 0x285   :  { %1492 = shalt.err (!%p1489_p3)
}
 0x286   :  { %1030 = dma.vmem_to_hbm [thread:$0]  %s1028_s23, 16, %s2157_s3, [#allocation4]  }
 0x287   :  { %1497 = dma.done.wait [#allocation4], 16  }
 0x288   :  { %1498 = vsyncadd [#allocation4], 4294967280 }
 0x289   :  { %1034 = vsyncpa [#allocation3], 1 }
 0x28a   :  { %1035 = vsyncpa [#allocation6], 1 }
 0x28b   :  { %1036 = vsyncpa [#allocation4], 1 }

</bundles_post_ra>
